<compile_context>
chip_gen: v7x
topology: tpu7x:2x2x1
jax: 0.10.0
libtpu: 0.0.40
codegen_flags: <defaults>
</compile_context>

<pallas_src>
import math
import functools

import jax
import jax.numpy as jnp
from jax.experimental import pallas as pl
from jax.experimental.pallas import tpu as pltpu

_VMEM_LIMIT = 48 * 1024 * 1024          # above 16/32 MiB defaults, < v7x 64 MiB
_TM_TARGET = 256                        # row-tile target (>=256 fills v6e MXU M)
_TQ_TARGET = 256                        # query-tile target for attention
_TN_TARGET = 1024                       # vocab N-tile target (multiple of 128)
_WDT = jnp.bfloat16                     # weight storage dtype


# ------------------------------ tiling helpers --------------------------------

def _pick_tile(total, target, align):
    """Largest tile <= target that divides `total` and is a multiple of `align`;
    falls back to the full extent (always a legal block) otherwise."""
    if total <= target:
        return total
    cand = (target // align) * align
    while cand >= align:
        if total % cand == 0:
            return cand
        cand -= align
    return total


def _row_call(kernel, args, row_flags, outs, tm_target=_TM_TARGET):
    """Row-tiled pallas_call.  `args[i]` is tiled over rows iff row_flags[i];
    other args are resident full blocks.  `outs` = [(n_cols, dtype), ...] and
    every output is a row-tiled [M, n_cols] array."""
    M = args[0].shape[0]
    tm = _pick_tile(M, tm_target, 8)
    in_specs = [
        pl.BlockSpec((tm, a.shape[1]), lambda i: (i, 0)) if r
        else pl.BlockSpec(a.shape, lambda i: (0, 0))
        for a, r in zip(args, row_flags)
    ]
    out_shape = tuple(jax.ShapeDtypeStruct((M, c), d) for c, d in outs)
    out_specs = tuple(pl.BlockSpec((tm, c), lambda i: (i, 0)) for c, _ in outs)
    return pl.pallas_call(
        kernel,
        grid=(M // tm,),
        in_specs=in_specs,
        out_specs=out_specs if len(outs) > 1 else out_specs[0],
        out_shape=out_shape if len(outs) > 1 else out_shape[0],
        compiler_params=pltpu.CompilerParams(
            dimension_semantics=("parallel",),
            vmem_limit_bytes=_VMEM_LIMIT),
    )(*args)


# ----------------------------- in-kernel helpers -------------------------------

def _ln(x, g, b):
    """LayerNorm over the last dim (f32 stats). x: [M, D], g/b: [1, D]."""
    mu = jnp.mean(x, axis=-1, keepdims=True)
    var = jnp.mean((x - mu) ** 2, axis=-1, keepdims=True)
    return (x - mu) * jax.lax.rsqrt(var + 1e-5) * g + b


def _bf(x):
    return x.astype(jnp.bfloat16)


# -------------------------------- Pallas kernels -------------------------------

def _ln_qkv_kernel(x_ref, w_ref, b_ref, g_ref, beta_ref, o_ref):
    """o = LN(x) @ Wqkv + bqkv   (bf16 matmul, f32 accumulate, bf16 out)."""
    h = _ln(x_ref[...], g_ref[...], beta_ref[...])
    qkv = jnp.dot(_bf(h), w_ref[...],
                  preferred_element_type=jnp.float32) + b_ref[...]
    o_ref[...] = qkv.astype(o_ref.dtype)


def _mha_kernel(q_ref, k_ref, v_ref, o_ref, *, scale, causal):
    """Single (batch*head, q-tile) attention step: full-Lk scores, in-kernel
    causal mask, softmax reciprocal folded into the [tq, dh] context."""
    # TODO(synk): flash-style Lk tiling with an online-softmax accumulator for
    # very long sequences (keeps score working set at O(tq*tk)).
    q = _bf(q_ref[0].astype(jnp.float32) * scale)        # [tq, dh] pre-scaled
    k = k_ref[0]                                          # [Lk, dh] bf16
    s = jax.lax.dot_general(q, k, (((1,), (1,)), ((), ())),
                            preferred_element_type=jnp.float32)   # [tq, Lk]
    if causal:
        tq, lk = s.shape
        row = (jax.lax.broadcasted_iota(jnp.int32, (tq, lk), 0)
               + pl.program_id(1) * tq)
        col = jax.lax.broadcasted_iota(jnp.int32, (tq, lk), 1)
        s = jnp.where(col > row, -1e30, s)
    m = jnp.max(s, axis=-1, keepdims=True)
    p = jnp.exp(s - m)
    denom = jnp.sum(p, axis=-1, keepdims=True)
    ctx = jnp.dot(_bf(p), v_ref[0], preferred_element_type=jnp.float32)
    ctx = ctx * pl.reciprocal(denom, approx=True)         # EUP slot, [tq, dh]
    o_ref[0] = ctx.astype(o_ref.dtype)


def _proj_ffn_kernel(x_ref, ctx_ref, wo_ref, bo_ref, g_ref, beta_ref,
                     w1_ref, b1_ref, w2_ref, b2_ref, o_ref):
    """x2 = x + ctx @ Wo + bo ;  o = x2 + relu(LN(x2) @ W1 + b1) @ W2 + b2."""
    # TODO(synk): add a dff/reduction grid axis with an f32 VMEM accumulator for
    # very large dim_feedforward.
    x2 = x_ref[...] + jnp.dot(ctx_ref[...], wo_ref[...],
                              preferred_element_type=jnp.float32) + bo_ref[...]
    h = _ln(x2, g_ref[...], beta_ref[...])
    t = jnp.maximum(
        jnp.dot(_bf(h), w1_ref[...],
                preferred_element_type=jnp.float32) + b1_ref[...], 0.0)
    o = x2 + jnp.dot(_bf(t), w2_ref[...],
                     preferred_element_type=jnp.float32) + b2_ref[...]
    o_ref[...] = o.astype(o_ref.dtype)


def _proj_ln_q_kernel(x_ref, ctx_ref, wo_ref, bo_ref, g_ref, beta_ref,
                      wq_ref, bq_ref, x2_ref, q_ref):
    """Decoder: x2 = x + ctx @ Wo_self + bo ; q_cross = LN2(x2) @ Wq + bq."""
    x2 = x_ref[...] + jnp.dot(ctx_ref[...], wo_ref[...],
                              preferred_element_type=jnp.float32) + bo_ref[...]
    h = _ln(x2, g_ref[...], beta_ref[...])
    q = jnp.dot(_bf(h), wq_ref[...],
                preferred_element_type=jnp.float32) + bq_ref[...]
    x2_ref[...] = x2.astype(x2_ref.dtype)
    q_ref[...] = q.astype(q_ref.dtype)


def _kv_proj_kernel(mem_ref, w_ref, b_ref, o_ref):
    """Cross-attention K/V projection of the (un-normed) encoder memory."""
    kv = jnp.dot(_bf(mem_ref[...]), w_ref[...],
                 preferred_element_type=jnp.float32) + b_ref[...]
    o_ref[...] = kv.astype(o_ref.dtype)


def _glu_kernel(x_ref, wa_ref, ba_ref, wg_ref, bg_ref, o_ref):
    """GLU with the [D, 2D] weight pre-split into two [D, D] blocks."""
    xb = _bf(x_ref[...])
    a = jnp.dot(xb, wa_ref[...], preferred_element_type=jnp.float32) + ba_ref[...]
    g = jnp.dot(xb, wg_ref[...], preferred_element_type=jnp.float32) + bg_ref[...]
    o_ref[...] = (a * jax.nn.sigmoid(g)).astype(o_ref.dtype)


def _fc_kernel(x_ref, w_ref, b_ref, o_ref):
    o_ref[...] = (jnp.dot(_bf(x_ref[...]), w_ref[...],
                          preferred_element_type=jnp.float32)
                  + b_ref[...]).astype(o_ref.dtype)


# ------------------------------- kernel wrappers -------------------------------

def mha(q, k, v, *, causal):
    """q: [BH, Lq, dh], k/v: [BH, Lk, dh] (bf16) -> ctx [BH, Lq, dh] bf16."""
    BH, Lq, dh = q.shape
    Lk = k.shape[1]
    tq = _pick_tile(Lq, _TQ_TARGET, 8)
    scale = 1.0 / math.sqrt(dh)
    return pl.pallas_call(
        functools.partial(_mha_kernel, scale=scale, causal=causal),
        grid=(BH, Lq // tq),
        in_specs=[
            pl.BlockSpec((1, tq, dh), lambda bh, qi: (bh, qi, 0)),
            pl.BlockSpec((1, Lk, dh), lambda bh, qi: (bh, 0, 0)),
            pl.BlockSpec((1, Lk, dh), lambda bh, qi: (bh, 0, 0)),
        ],
        out_specs=pl.BlockSpec((1, tq, dh), lambda bh, qi: (bh, qi, 0)),
        out_shape=jax.ShapeDtypeStruct((BH, Lq, dh), jnp.bfloat16),
        compiler_params=pltpu.CompilerParams(
            dimension_semantics=("parallel", "parallel"),
            vmem_limit_bytes=_VMEM_LIMIT),
    )(q, k, v)


def final_projection(x_flat, w, b):
    """x_flat: [M, D] f32, w: [D, N] bf16 -> [M, N] f32, tiled over (M, N)."""
    M, D = x_flat.shape
    N = w.shape[1]
    tm = _pick_tile(M, _TM_TARGET, 8)
    tn = _pick_tile(N, _TN_TARGET, 128)
    return pl.pallas_call(
        _fc_kernel,
        grid=(M // tm, N // tn),
        in_specs=[pl.BlockSpec((tm, D), lambda i, j: (i, 0)),
                  pl.BlockSpec((D, tn), lambda i, j: (0, j)),
                  pl.BlockSpec((1, tn), lambda i, j: (0, j))],
        out_specs=pl.BlockSpec((tm, tn), lambda i, j: (i, j)),
        out_shape=jax.ShapeDtypeStruct((M, N), jnp.float32),
        compiler_params=pltpu.CompilerParams(
            dimension_semantics=("parallel", "parallel"),
            vmem_limit_bytes=_VMEM_LIMIT),
    )(x_flat, w, b)


# -------------------------- head split / merge (XLA side) ----------------------

def _split_heads_qkv(qkv_flat, B, L, nhead):
    D = qkv_flat.shape[1] // 3
    dh = D // nhead
    a = qkv_flat.reshape(B, L, 3, nhead, dh).transpose(2, 0, 3, 1, 4)
    a = a.reshape(3, B * nhead, L, dh)
    return a[0], a[1], a[2]


def _split_heads_kv(kv_flat, B, L, nhead):
    D = kv_flat.shape[1] // 2
    dh = D // nhead
    a = kv_flat.reshape(B, L, 2, nhead, dh).transpose(2, 0, 3, 1, 4)
    a = a.reshape(2, B * nhead, L, dh)
    return a[0], a[1]


def _split_heads(x_flat, B, L, nhead):
    D = x_flat.shape[1]
    dh = D // nhead
    return x_flat.reshape(B, L, nhead, dh).transpose(0, 2, 1, 3).reshape(
        B * nhead, L, dh)


def _merge_heads(ctx, B, L, nhead):
    dh = ctx.shape[-1]
    return ctx.reshape(B, nhead, L, dh).transpose(0, 2, 1, 3).reshape(
        B * L, nhead * dh)


# ------------------------------- model components ------------------------------

def positional_encoding(seq_len, d_model):
    pos = jnp.arange(seq_len, dtype=jnp.float32)[:, None]
    div = jnp.exp(jnp.arange(0, d_model, 2, dtype=jnp.float32)
                  * (-math.log(10000.0) / d_model))
    pe = jnp.zeros((seq_len, d_model), jnp.float32)
    pe = pe.at[:, 0::2].set(jnp.sin(pos * div))
    pe = pe.at[:, 1::2].set(jnp.cos(pos * div))
    return pe                                              # [L, D]


def embed_with_glu(tokens_bf, emb_table, glu_p, d_model):
    """tokens_bf: [B, L] -> [B, L, D].  Gather + pos-enc via XLA, GLU fused."""
    B, L = tokens_bf.shape
    x = emb_table[tokens_bf] * math.sqrt(d_model)          # [B, L, D]
    x = x + positional_encoding(L, d_model)[None]          # dropout = identity
    y = _row_call(_glu_kernel,
                  [x.reshape(B * L, d_model),
                   glu_p["wa"], glu_p["ba"], glu_p["wg"], glu_p["bg"]],
                  [True, False, False, False, False],
                  [(d_model, jnp.float32)])
    return y.reshape(B, L, d_model)


def encoder_layer(x, p, nhead):
    """Pre-norm TransformerEncoderLayer with causal self-attention mask."""
    B, L, D = x.shape
    x_flat = x.reshape(B * L, D)
    qkv = _row_call(_ln_qkv_kernel,
                    [x_flat, p["wqkv"], p["bqkv"], p["ln1_g"], p["ln1_b"]],
                    [True, False, False, False, False],
                    [(3 * D, jnp.bfloat16)])
    q, k, v = _split_heads_qkv(qkv, B, L, nhead)
    ctx = _merge_heads(mha(q, k, v, causal=True), B, L, nhead)
    out = _row_call(_proj_ffn_kernel,
                    [x_flat, ctx, p["wo"], p["bo"], p["ln2_g"], p["ln2_b"],
                     p["w1"], p["b1"], p["w2"], p["b2"]],
                    [True, True] + [False] * 8,
                    [(D, jnp.float32)])
    return out.reshape(B, L, D)


def decoder_layer(y, memory_flat, p, nhead, B, Lt, Ls):
    """Pre-norm TransformerDecoderLayer: causal self-attn, unmasked cross-attn
    (memory_key_padding_mask is an all-zero float mask in the reference), FFN."""
    D = y.shape[-1]
    y_flat = y.reshape(B * Lt, D)

    # --- causal self-attention ------------------------------------------------
    qkv = _row_call(_ln_qkv_kernel,
                    [y_flat, p["sa_wqkv"], p["sa_bqkv"], p["ln1_g"], p["ln1_b"]],
                    [True, False, False, False, False],
                    [(3 * D, jnp.bfloat16)])
    q, k, v = _split_heads_qkv(qkv, B, Lt, nhead)
    ctx = _merge_heads(mha(q, k, v, causal=True), B, Lt, nhead)

    # --- self out-proj + residual + LN2 + cross-attn Q projection (fused) ------
    x2_flat, q_cross = _row_call(
        _proj_ln_q_kernel,
        [y_flat, ctx, p["sa_wo"], p["sa_bo"], p["ln2_g"], p["ln2_b"],
         p["ca_wq"], p["ca_bq"]],
        [True, True] + [False] * 6,
        [(D, jnp.float32), (D, jnp.bfloat16)])

    # --- cross-attention (K/V from un-normed encoder memory) -------------------
    kv_mem = _row_call(_kv_proj_kernel,
                       [memory_flat, p["ca_wkv"], p["ca_bkv"]],
                       [True, False, False],
                       [(2 * D, jnp.bfloat16)])
    qc = _split_heads(q_cross, B, Lt, nhead)
    kc, vc = _split_heads_kv(kv_mem, B, Ls, nhead)
    ctx2 = _merge_heads(mha(qc, kc, vc, causal=False), B, Lt, nhead)

    # --- cross out-proj + residual + LN3 + FFN + residual (fused) ---------------
    out = _row_call(_proj_ffn_kernel,
                    [x2_flat, ctx2, p["ca_wo"], p["ca_bo"], p["ln3_g"],
                     p["ln3_b"], p["w1"], p["b1"], p["w2"], p["b2"]],
                    [True, True] + [False] * 8,
                    [(D, jnp.float32)])
    return out.reshape(B, Lt, D)


def transformer_forward(src, tgt, params, nhead):
    """src/tgt: [seq, batch] int32 token ids -> [tgt_len, batch, ntokens]."""
    d_model = params["enc_emb"].shape[1]
    src_bf, tgt_bf = src.T, tgt.T                           # batch-first
    B, Ls = src_bf.shape
    Lt = tgt_bf.shape[1]

    # Encoder (causal src mask, as in the reference).
    x = embed_with_glu(src_bf, params["enc_emb"], params["enc_glu"], d_model)
    for p in params["enc_layers"]:
        x = encoder_layer(x, p, nhead)
    memory_flat = x.reshape(B * Ls, d_model)

    # Decoder.
    y = embed_with_glu(tgt_bf, params["dec_emb"], params["dec_glu"], d_model)
    for p in params["dec_layers"]:
        y = decoder_layer(y, memory_flat, p, nhead, B, Lt, Ls)

    out = final_projection(y.reshape(B * Lt, d_model),
                           params["fc_w"], params["fc_b"])  # [B*Lt, ntokens]
    out = out.reshape(B, Lt, -1)
    return jnp.transpose(out, (1, 0, 2))                    # [Lt, B, ntokens]


# --------------------------------- parameter init ------------------------------

def _init_linear(key, fan_in, fan_out):
    k1, k2 = jax.random.split(key)
    w = (jax.random.normal(k1, (fan_in, fan_out), jnp.float32)
         / math.sqrt(fan_in)).astype(_WDT)                  # bf16 weight storage
    b = jax.random.normal(k2, (1, fan_out), jnp.float32) * 0.01
    return w, b


def _ln_params(d_model):
    return jnp.ones((1, d_model), jnp.float32), jnp.zeros((1, d_model), jnp.float32)


def _init_glu(key, d_model):
    k1, k2 = jax.random.split(key)
    wa, ba = _init_linear(k1, d_model, d_model)
    wg, bg = _init_linear(k2, d_model, d_model)
    return dict(wa=wa, ba=ba, wg=wg, bg=bg)


def _init_enc_layer(key, d_model, dff):
    ks = jax.random.split(key, 4)
    wqkv, bqkv = _init_linear(ks[0], d_model, 3 * d_model)
    wo, bo = _init_linear(ks[1], d_model, d_model)
    w1, b1 = _init_linear(ks[2], d_model, dff)
    w2, b2 = _init_linear(ks[3], dff, d_model)
    g1, bb1 = _ln_params(d_model)
    g2, bb2 = _ln_params(d_model)
    return dict(wqkv=wqkv, bqkv=bqkv, wo=wo, bo=bo,
                ln1_g=g1, ln1_b=bb1, ln2_g=g2, ln2_b=bb2,
                w1=w1, b1=b1, w2=w2, b2=b2)


def _init_dec_layer(key, d_model, dff):
    ks = jax.random.split(key, 7)
    sa_wqkv, sa_bqkv = _init_linear(ks[0], d_model, 3 * d_model)
    sa_wo, sa_bo = _init_linear(ks[1], d_model, d_model)
    ca_wq, ca_bq = _init_linear(ks[2], d_model, d_model)
    ca_wkv, ca_bkv = _init_linear(ks[3], d_model, 2 * d_model)
    ca_wo, ca_bo = _init_linear(ks[4], d_model, d_model)
    w1, b1 = _init_linear(ks[5], d_model, dff)
    w2, b2 = _init_linear(ks[6], dff, d_model)
    g1, bb1 = _ln_params(d_model)
    g2, bb2 = _ln_params(d_model)
    g3, bb3 = _ln_params(d_model)
    return dict(sa_wqkv=sa_wqkv, sa_bqkv=sa_bqkv, sa_wo=sa_wo, sa_bo=sa_bo,
                ca_wq=ca_wq, ca_bq=ca_bq, ca_wkv=ca_wkv, ca_bkv=ca_bkv,
                ca_wo=ca_wo, ca_bo=ca_bo,
                ln1_g=g1, ln1_b=bb1, ln2_g=g2, ln2_b=bb2, ln3_g=g3, ln3_b=bb3,
                w1=w1, b1=b1, w2=w2, b2=b2)


def init_params(key, num_layers_enc, num_layers_dec, d_model, dff, ntokens):
    keys = jax.random.split(key, 8 + num_layers_enc + num_layers_dec)
    enc_emb = jax.random.normal(keys[0], (ntokens, d_model), jnp.float32)
    enc_emb = enc_emb.at[0].set(0.0)                        # padding_idx = 0
    dec_emb = jax.random.normal(keys[1], (ntokens, d_model), jnp.float32)
    dec_emb = dec_emb.at[0].set(0.0)
    fc_w, fc_b = _init_linear(keys[4], d_model, ntokens)
    enc_layers = [_init_enc_layer(keys[8 + i], d_model, dff)
                  for i in range(num_layers_enc)]
    dec_layers = [_init_dec_layer(keys[8 + num_layers_enc + i], d_model, dff)
                  for i in range(num_layers_dec)]
    return dict(enc_emb=enc_emb, dec_emb=dec_emb,
                enc_glu=_init_glu(keys[2], d_model),
                dec_glu=_init_glu(keys[3], d_model),
                fc_w=fc_w, fc_b=fc_b,
                enc_layers=enc_layers, dec_layers=dec_layers)


# -------------------------------------- main ------------------------------------

if __name__ == "__main__":
    num_layers_encoder = 2
    num_layers_decoder = 2
    d_model = 32
    nhead = 4
    dff = 64
    ntokens = 50
    src_len, tgt_len, batch = 8, 8, 2

    key = jax.random.PRNGKey(0)
    k_params, k_src, k_tgt = jax.random.split(key, 3)

    params = init_params(k_params, num_layers_encoder, num_layers_decoder,
                         d_model, dff, ntokens)

    # Token ids in [1, ntokens) (0 is the padding id).
    src = jax.random.randint(k_src, (src_len, batch), 1, ntokens, dtype=jnp.int32)
    tgt = jax.random.randint(k_tgt, (tgt_len, batch), 1, ntokens, dtype=jnp.int32)

    fwd = jax.jit(transformer_forward, static_argnames=("nhead",))
    out = fwd(src, tgt, params, nhead=nhead)
    out = jax.block_until_ready(out)

    assert out.shape == (tgt_len, batch, ntokens), out.shape
    assert bool(jnp.all(jnp.isfinite(out)))
    print("KERNEL_OK")
</pallas_src>

<mosaic_0001>
module attributes {stable_mosaic.version = 11 : i64} {
  func.func @_glu_kernel(%arg0: i32, %arg1: memref<16x32xf32, #tpu.memory_space<vmem>>, %arg2: memref<32x32xbf16, #tpu.memory_space<vmem>>, %arg3: memref<1x32xf32, #tpu.memory_space<vmem>>, %arg4: memref<32x32xbf16, #tpu.memory_space<vmem>>, %arg5: memref<1x32xf32, #tpu.memory_space<vmem>>, %arg6: memref<16x32xf32, #tpu.memory_space<vmem>>) attributes {dimension_semantics = [#tpu.dimension_semantics<parallel>], iteration_bounds = array<i64: 1>, scalar_prefetch = 0 : i64, scratch_operands = 0 : i64, tpu.core_type = #tpu.core_type<tc>, window_params = [{transform_indices = @transform_0, window_bounds = array<i64: 16, 32>}, {pipeline_mode = #tpu.pipeline_mode<synchronous>, transform_indices = @transform_1, window_bounds = array<i64: 32, 32>}, {pipeline_mode = #tpu.pipeline_mode<synchronous>, transform_indices = @transform_2, window_bounds = array<i64: 1, 32>}, {pipeline_mode = #tpu.pipeline_mode<synchronous>, transform_indices = @transform_3, window_bounds = array<i64: 32, 32>}, {pipeline_mode = #tpu.pipeline_mode<synchronous>, transform_indices = @transform_4, window_bounds = array<i64: 1, 32>}, {transform_indices = @transform_5, window_bounds = array<i64: 16, 32>}]} {
    %c0 = arith.constant 0 : index
    %c0_0 = arith.constant 0 : index
    %0 = vector.load %arg1[%c0, %c0_0] : memref<16x32xf32, #tpu.memory_space<vmem>>, vector<16x32xf32>
    %1 = arith.truncf %0 : vector<16x32xf32> to vector<16x32xbf16>
    %c0_1 = arith.constant 0 : index
    %c0_2 = arith.constant 0 : index
    %2 = vector.load %arg2[%c0_1, %c0_2] : memref<32x32xbf16, #tpu.memory_space<vmem>>, vector<32x32xbf16>
    %cst = arith.constant dense<0.000000e+00> : vector<16x32xf32>
    %3 = tpu.matmul %1, %2, %cst {dimension_numbers = #tpu.dot_dimension_numbers<[1], [0], [0], [1], [0, 0, 1, 1], [], []>} : vector<16x32xbf16>, vector<32x32xbf16>, vector<16x32xf32> -> vector<16x32xf32>
    %c0_3 = arith.constant 0 : index
    %c0_4 = arith.constant 0 : index
    %4 = vector.load %arg3[%c0_3, %c0_4] : memref<1x32xf32, #tpu.memory_space<vmem>>, vector<1x32xf32>
    %5 = vector.broadcast %4 : vector<1x32xf32> to vector<16x32xf32>
    %6 = arith.addf %3, %5 : vector<16x32xf32>
    %c0_5 = arith.constant 0 : index
    %c0_6 = arith.constant 0 : index
    %7 = vector.load %arg4[%c0_5, %c0_6] : memref<32x32xbf16, #tpu.memory_space<vmem>>, vector<32x32xbf16>
    %cst_7 = arith.constant dense<0.000000e+00> : vector<16x32xf32>
    %8 = tpu.matmul %1, %7, %cst_7 {dimension_numbers = #tpu.dot_dimension_numbers<[1], [0], [0], [1], [0, 0, 1, 1], [], []>} : vector<16x32xbf16>, vector<32x32xbf16>, vector<16x32xf32> -> vector<16x32xf32>
    %c0_8 = arith.constant 0 : index
    %c0_9 = arith.constant 0 : index
    %9 = vector.load %arg5[%c0_8, %c0_9] : memref<1x32xf32, #tpu.memory_space<vmem>>, vector<1x32xf32>
    %10 = vector.broadcast %9 : vector<1x32xf32> to vector<16x32xf32>
    %11 = arith.addf %8, %10 : vector<16x32xf32>
    %12 = arith.negf %11 : vector<16x32xf32>
    %13 = math.exp %12 : vector<16x32xf32>
    %cst_10 = arith.constant 1.000000e+00 : f32
    %14 = vector.broadcast %cst_10 : f32 to vector<16x32xf32>
    %15 = arith.addf %14, %13 : vector<16x32xf32>
    %16 = arith.divf %14, %15 : vector<16x32xf32>
    %17 = arith.mulf %6, %16 : vector<16x32xf32>
    %c0_11 = arith.constant 0 : index
    %c0_12 = arith.constant 0 : index
    %18 = vector.load %arg6[%c0_11, %c0_12] : memref<16x32xf32, #tpu.memory_space<vmem>>, vector<16x32xf32>
    tpu.vector_store %arg6[%c0_11, %c0_12], %17 {strides = array<i32>} : memref<16x32xf32, #tpu.memory_space<vmem>>, vector<16x32xf32>,
    return
  }
  func.func @transform_0(%arg0: i32) -> (i32, i32) {
    %c0_i32 = arith.constant 0 : i32
    %c0_i32_0 = arith.constant 0 : i32
    return %arg0, %c0_i32 : i32, i32
  }
  func.func @transform_1(%arg0: i32) -> (i32, i32) {
    %c0_i32 = arith.constant 0 : i32
    %c0_i32_0 = arith.constant 0 : i32
    %c0_i32_1 = arith.constant 0 : i32
    return %c0_i32, %c0_i32_0 : i32, i32
  }
  func.func @transform_2(%arg0: i32) -> (i32, i32) {
    %c0_i32 = arith.constant 0 : i32
    %c0_i32_0 = arith.constant 0 : i32
    %c0_i32_1 = arith.constant 0 : i32
    return %c0_i32, %c0_i32_0 : i32, i32
  }
  func.func @transform_3(%arg0: i32) -> (i32, i32) {
    %c0_i32 = arith.constant 0 : i32
    %c0_i32_0 = arith.constant 0 : i32
    %c0_i32_1 = arith.constant 0 : i32
    return %c0_i32, %c0_i32_0 : i32, i32
  }
  func.func @transform_4(%arg0: i32) -> (i32, i32) {
    %c0_i32 = arith.constant 0 : i32
    %c0_i32_0 = arith.constant 0 : i32
    %c0_i32_1 = arith.constant 0 : i32
    return %c0_i32, %c0_i32_0 : i32, i32
  }
  func.func @transform_5(%arg0: i32) -> (i32, i32) {
    %c0_i32 = arith.constant 0 : i32
    %c0_i32_0 = arith.constant 0 : i32
    return %arg0, %c0_i32 : i32, i32
  }
}

module attributes {stable_mosaic.version = 11 : i64} {
  func.func @_ln_qkv_kernel(%arg0: i32, %arg1: memref<16x32xf32, #tpu.memory_space<vmem>>, %arg2: memref<32x96xbf16, #tpu.memory_space<vmem>>, %arg3: memref<1x96xf32, #tpu.memory_space<vmem>>, %arg4: memref<1x32xf32, #tpu.memory_space<vmem>>, %arg5: memref<1x32xf32, #tpu.memory_space<vmem>>, %arg6: memref<16x96xbf16, #tpu.memory_space<vmem>>) attributes {dimension_semantics = [#tpu.dimension_semantics<parallel>], iteration_bounds = array<i64: 1>, scalar_prefetch = 0 : i64, scratch_operands = 0 : i64, tpu.core_type = #tpu.core_type<tc>, window_params = [{transform_indices = @transform_0, window_bounds = array<i64: 16, 32>}, {pipeline_mode = #tpu.pipeline_mode<synchronous>, transform_indices = @transform_1, window_bounds = array<i64: 32, 96>}, {pipeline_mode = #tpu.pipeline_mode<synchronous>, transform_indices = @transform_2, window_bounds = array<i64: 1, 96>}, {pipeline_mode = #tpu.pipeline_mode<synchronous>, transform_indices = @transform_3, window_bounds = array<i64: 1, 32>}, {pipeline_mode = #tpu.pipeline_mode<synchronous>, transform_indices = @transform_4, window_bounds = array<i64: 1, 32>}, {transform_indices = @transform_5, window_bounds = array<i64: 16, 96>}]} {
    %c0 = arith.constant 0 : index
    %c0_0 = arith.constant 0 : index
    %0 = vector.load %arg1[%c0, %c0_0] : memref<16x32xf32, #tpu.memory_space<vmem>>, vector<16x32xf32>
    %c0_1 = arith.constant 0 : index
    %c0_2 = arith.constant 0 : index
    %1 = vector.load %arg4[%c0_1, %c0_2] : memref<1x32xf32, #tpu.memory_space<vmem>>, vector<1x32xf32>
    %c0_3 = arith.constant 0 : index
    %c0_4 = arith.constant 0 : index
    %2 = vector.load %arg5[%c0_3, %c0_4] : memref<1x32xf32, #tpu.memory_space<vmem>>, vector<1x32xf32>
    %cst = arith.constant dense<0.000000e+00> : vector<16xf32>
    %3 = vector.multi_reduction <add>, %0, %cst [1] : vector<16x32xf32> to vector<16xf32>
    %4 = vector.shape_cast %3 : vector<16xf32> to vector<16x1xf32>
    %cst_5 = arith.constant 3.200000e+01 : f32
    %5 = vector.broadcast %cst_5 : f32 to vector<16x1xf32>
    %6 = arith.divf %4, %5 : vector<16x1xf32>
    %7 = vector.broadcast %6 : vector<16x1xf32> to vector<16x32xf32>
    %8 = arith.subf %0, %7 : vector<16x32xf32>
    %9 = arith.mulf %8, %8 : vector<16x32xf32>
    %cst_6 = arith.constant dense<0.000000e+00> : vector<16xf32>
    %10 = vector.multi_reduction <add>, %9, %cst_6 [1] : vector<16x32xf32> to vector<16xf32>
    %11 = vector.shape_cast %10 : vector<16xf32> to vector<16x1xf32>
    %cst_7 = arith.constant 3.200000e+01 : f32
    %12 = vector.broadcast %cst_7 : f32 to vector<16x1xf32>
    %13 = arith.divf %11, %12 : vector<16x1xf32>
    %14 = vector.broadcast %6 : vector<16x1xf32> to vector<16x32xf32>
    %15 = arith.subf %0, %14 : vector<16x32xf32>
    %cst_8 = arith.constant 9.99999974E-6 : f32
    %16 = vector.broadcast %cst_8 : f32 to vector<16x1xf32>
    %17 = arith.addf %13, %16 : vector<16x1xf32>
    %18 = math.rsqrt %17 : vector<16x1xf32>
    %19 = vector.broadcast %18 : vector<16x1xf32> to vector<16x32xf32>
    %20 = arith.mulf %15, %19 : vector<16x32xf32>
    %21 = vector.broadcast %1 : vector<1x32xf32> to vector<16x32xf32>
    %22 = arith.mulf %20, %21 : vector<16x32xf32>
    %23 = vector.broadcast %2 : vector<1x32xf32> to vector<16x32xf32>
    %24 = arith.addf %22, %23 : vector<16x32xf32>
    %25 = arith.truncf %24 : vector<16x32xf32> to vector<16x32xbf16>
    %c0_9 = arith.constant 0 : index
    %c0_10 = arith.constant 0 : index
    %26 = vector.load %arg2[%c0_9, %c0_10] : memref<32x96xbf16, #tpu.memory_space<vmem>>, vector<32x96xbf16>
    %cst_11 = arith.constant dense<0.000000e+00> : vector<16x96xf32>
    %27 = tpu.matmul %25, %26, %cst_11 {dimension_numbers = #tpu.dot_dimension_numbers<[1], [0], [0], [1], [0, 0, 1, 1], [], []>} : vector<16x32xbf16>, vector<32x96xbf16>, vector<16x96xf32> -> vector<16x96xf32>
    %c0_12 = arith.constant 0 : index
    %c0_13 = arith.constant 0 : index
    %28 = vector.load %arg3[%c0_12, %c0_13] : memref<1x96xf32, #tpu.memory_space<vmem>>, vector<1x96xf32>
    %29 = vector.broadcast %28 : vector<1x96xf32> to vector<16x96xf32>
    %30 = arith.addf %27, %29 : vector<16x96xf32>
    %31 = arith.truncf %30 : vector<16x96xf32> to vector<16x96xbf16>
    %c0_14 = arith.constant 0 : index
    %c0_15 = arith.constant 0 : index
    %32 = vector.load %arg6[%c0_14, %c0_15] : memref<16x96xbf16, #tpu.memory_space<vmem>>, vector<16x96xbf16>
    tpu.vector_store %arg6[%c0_14, %c0_15], %31 {strides = array<i32>} : memref<16x96xbf16, #tpu.memory_space<vmem>>, vector<16x96xbf16>,
    return
  }
  func.func @transform_0(%arg0: i32) -> (i32, i32) {
    %c0_i32 = arith.constant 0 : i32
    %c0_i32_0 = arith.constant 0 : i32
    return %arg0, %c0_i32 : i32, i32
  }
  func.func @transform_1(%arg0: i32) -> (i32, i32) {
    %c0_i32 = arith.constant 0 : i32
    %c0_i32_0 = arith.constant 0 : i32
    %c0_i32_1 = arith.constant 0 : i32
    return %c0_i32, %c0_i32_0 : i32, i32
  }
  func.func @transform_2(%arg0: i32) -> (i32, i32) {
    %c0_i32 = arith.constant 0 : i32
    %c0_i32_0 = arith.constant 0 : i32
    %c0_i32_1 = arith.constant 0 : i32
    return %c0_i32, %c0_i32_0 : i32, i32
  }
  func.func @transform_3(%arg0: i32) -> (i32, i32) {
    %c0_i32 = arith.constant 0 : i32
    %c0_i32_0 = arith.constant 0 : i32
    %c0_i32_1 = arith.constant 0 : i32
    return %c0_i32, %c0_i32_0 : i32, i32
  }
  func.func @transform_4(%arg0: i32) -> (i32, i32) {
    %c0_i32 = arith.constant 0 : i32
    %c0_i32_0 = arith.constant 0 : i32
    %c0_i32_1 = arith.constant 0 : i32
    return %c0_i32, %c0_i32_0 : i32, i32
  }
  func.func @transform_5(%arg0: i32) -> (i32, i32) {
    %c0_i32 = arith.constant 0 : i32
    %c0_i32_0 = arith.constant 0 : i32
    return %arg0, %c0_i32 : i32, i32
  }
}

module attributes {stable_mosaic.version = 11 : i64} {
  func.func @_mha_kernel(%arg0: i32, %arg1: i32, %arg2: memref<1x8x8xbf16, #tpu.memory_space<vmem>>, %arg3: memref<1x8x8xbf16, #tpu.memory_space<vmem>>, %arg4: memref<1x8x8xbf16, #tpu.memory_space<vmem>>, %arg5: memref<1x8x8xbf16, #tpu.memory_space<vmem>>) attributes {dimension_semantics = [#tpu.dimension_semantics<parallel>, #tpu.dimension_semantics<parallel>], iteration_bounds = array<i64: 8, 1>, scalar_prefetch = 0 : i64, scratch_operands = 0 : i64, tpu.core_type = #tpu.core_type<tc>, window_params = [{transform_indices = @transform_0, window_bounds = array<i64: 1, 8, 8>}, {transform_indices = @transform_1, window_bounds = array<i64: 1, 8, 8>}, {transform_indices = @transform_2, window_bounds = array<i64: 1, 8, 8>}, {transform_indices = @transform_3, window_bounds = array<i64: 1, 8, 8>}]} {
    %c0 = arith.constant 0 : index
    %c0_0 = arith.constant 0 : index
    %c0_1 = arith.constant 0 : index
    %0 = vector.load %arg2[%c0, %c0_0, %c0_1] : memref<1x8x8xbf16, #tpu.memory_space<vmem>>, vector<1x8x8xbf16>
    %1 = vector.shape_cast %0 : vector<1x8x8xbf16> to vector<8x8xbf16>
    %2 = arith.extf %1 : vector<8x8xbf16> to vector<8x8xf32>
    %cst = arith.constant 0.353553385 : f32
    %3 = vector.broadcast %cst : f32 to vector<8x8xf32>
    %4 = arith.mulf %2, %3 : vector<8x8xf32>
    %5 = arith.truncf %4 : vector<8x8xf32> to vector<8x8xbf16>
    %c0_2 = arith.constant 0 : index
    %c0_3 = arith.constant 0 : index
    %c0_4 = arith.constant 0 : index
    %6 = vector.load %arg3[%c0_2, %c0_3, %c0_4] : memref<1x8x8xbf16, #tpu.memory_space<vmem>>, vector<1x8x8xbf16>
    %7 = vector.shape_cast %6 : vector<1x8x8xbf16> to vector<8x8xbf16>
    %cst_5 = arith.constant dense<0.000000e+00> : vector<8x8xf32>
    %8 = tpu.matmul %5, %7, %cst_5 {dimension_numbers = #tpu.dot_dimension_numbers<[1], [1], [0], [0], [0, 0, 1, 0], [], []>} : vector<8x8xbf16>, vector<8x8xbf16>, vector<8x8xf32> -> vector<8x8xf32>
    %9 = tpu.iota {dimensions = array<i32: 0>} : vector<8x8xi32>
    %c8_i32 = arith.constant 8 : i32
    %10 = arith.muli %arg1, %c8_i32 : i32
    %11 = vector.broadcast %10 : i32 to vector<8x8xi32>
    %12 = arith.addi %9, %11 : vector<8x8xi32>
    %13 = tpu.iota {dimensions = array<i32: 1>} : vector<8x8xi32>
    %14 = arith.cmpi sgt, %13, %12 : vector<8x8xi32>
    %cst_6 = arith.constant -1.000000e+30 : f32
    %15 = vector.broadcast %cst_6 : f32 to vector<8x8xf32>
    %16 = arith.select %14, %15, %8 : vector<8x8xi1>, vector<8x8xf32>
    %cst_7 = arith.constant dense<0xFF800000> : vector<8xf32>
    %17 = vector.multi_reduction <maximumf>, %16, %cst_7 [1] : vector<8x8xf32> to vector<8xf32>
    %18 = vector.shape_cast %17 : vector<8xf32> to vector<8x1xf32>
    %19 = vector.broadcast %18 : vector<8x1xf32> to vector<8x8xf32>
    %20 = arith.subf %16, %19 : vector<8x8xf32>
    %21 = math.exp %20 : vector<8x8xf32>
    %cst_8 = arith.constant dense<0.000000e+00> : vector<8xf32>
    %22 = vector.multi_reduction <add>, %21, %cst_8 [1] : vector<8x8xf32> to vector<8xf32>
    %23 = vector.shape_cast %22 : vector<8xf32> to vector<8x1xf32>
    %24 = arith.truncf %21 : vector<8x8xf32> to vector<8x8xbf16>
    %c0_9 = arith.constant 0 : index
    %c0_10 = arith.constant 0 : index
    %c0_11 = arith.constant 0 : index
    %25 = vector.load %arg4[%c0_9, %c0_10, %c0_11] : memref<1x8x8xbf16, #tpu.memory_space<vmem>>, vector<1x8x8xbf16>
    %26 = vector.shape_cast %25 : vector<1x8x8xbf16> to vector<8x8xbf16>
    %cst_12 = arith.constant dense<0.000000e+00> : vector<8x8xf32>
    %27 = tpu.matmul %24, %26, %cst_12 {dimension_numbers = #tpu.dot_dimension_numbers<[1], [0], [0], [1], [0, 0, 1, 1], [], []>} : vector<8x8xbf16>, vector<8x8xbf16>, vector<8x8xf32> -> vector<8x8xf32>
    %28 = tpu.reciprocal %23 {approx = true} : vector<8x1xf32> -> vector<8x1xf32>
    %29 = vector.broadcast %28 : vector<8x1xf32> to vector<8x8xf32>
    %30 = arith.mulf %27, %29 : vector<8x8xf32>
    %31 = arith.truncf %30 : vector<8x8xf32> to vector<8x8xbf16>
    %c0_13 = arith.constant 0 : index
    %c0_14 = arith.constant 0 : index
    %c0_15 = arith.constant 0 : index
    %32 = vector.load %arg5[%c0_13, %c0_14, %c0_15] : memref<1x8x8xbf16, #tpu.memory_space<vmem>>, vector<1x8x8xbf16>
    %33 = vector.shape_cast %32 : vector<1x8x8xbf16> to vector<8x8xbf16>
    %34 = vector.shape_cast %31 : vector<8x8xbf16> to vector<1x8x8xbf16>
    tpu.vector_store %arg5[%c0_13, %c0_14, %c0_15], %34 {strides = array<i32>} : memref<1x8x8xbf16, #tpu.memory_space<vmem>>, vector<1x8x8xbf16>,
    return
  }
  func.func @transform_0(%arg0: i32, %arg1: i32) -> (i32, i32, i32) {
    %c0_i32 = arith.constant 0 : i32
    %c0_i32_0 = arith.constant 0 : i32
    return %arg0, %arg1, %c0_i32 : i32, i32, i32
  }
  func.func @transform_1(%arg0: i32, %arg1: i32) -> (i32, i32, i32) {
    %c0_i32 = arith.constant 0 : i32
    %c0_i32_0 = arith.constant 0 : i32
    %c0_i32_1 = arith.constant 0 : i32
    return %arg0, %c0_i32, %c0_i32_0 : i32, i32, i32
  }
  func.func @transform_2(%arg0: i32, %arg1: i32) -> (i32, i32, i32) {
    %c0_i32 = arith.constant 0 : i32
    %c0_i32_0 = arith.constant 0 : i32
    %c0_i32_1 = arith.constant 0 : i32
    return %arg0, %c0_i32, %c0_i32_0 : i32, i32, i32
  }
  func.func @transform_3(%arg0: i32, %arg1: i32) -> (i32, i32, i32) {
    %c0_i32 = arith.constant 0 : i32
    %c0_i32_0 = arith.constant 0 : i32
    return %arg0, %arg1, %c0_i32 : i32, i32, i32
  }
}

module attributes {stable_mosaic.version = 11 : i64} {
  func.func @_proj_ln_q_kernel(%arg0: i32, %arg1: memref<16x32xf32, #tpu.memory_space<vmem>>, %arg2: memref<16x32xbf16, #tpu.memory_space<vmem>>, %arg3: memref<32x32xbf16, #tpu.memory_space<vmem>>, %arg4: memref<1x32xf32, #tpu.memory_space<vmem>>, %arg5: memref<1x32xf32, #tpu.memory_space<vmem>>, %arg6: memref<1x32xf32, #tpu.memory_space<vmem>>, %arg7: memref<32x32xbf16, #tpu.memory_space<vmem>>, %arg8: memref<1x32xf32, #tpu.memory_space<vmem>>, %arg9: memref<16x32xf32, #tpu.memory_space<vmem>>, %arg10: memref<16x32xbf16, #tpu.memory_space<vmem>>) attributes {dimension_semantics = [#tpu.dimension_semantics<parallel>], iteration_bounds = array<i64: 1>, scalar_prefetch = 0 : i64, scratch_operands = 0 : i64, tpu.core_type = #tpu.core_type<tc>, window_params = [{transform_indices = @transform_0, window_bounds = array<i64: 16, 32>}, {transform_indices = @transform_1, window_bounds = array<i64: 16, 32>}, {pipeline_mode = #tpu.pipeline_mode<synchronous>, transform_indices = @transform_2, window_bounds = array<i64: 32, 32>}, {pipeline_mode = #tpu.pipeline_mode<synchronous>, transform_indices = @transform_3, window_bounds = array<i64: 1, 32>}, {pipeline_mode = #tpu.pipeline_mode<synchronous>, transform_indices = @transform_4, window_bounds = array<i64: 1, 32>}, {pipeline_mode = #tpu.pipeline_mode<synchronous>, transform_indices = @transform_5, window_bounds = array<i64: 1, 32>}, {pipeline_mode = #tpu.pipeline_mode<synchronous>, transform_indices = @transform_6, window_bounds = array<i64: 32, 32>}, {pipeline_mode = #tpu.pipeline_mode<synchronous>, transform_indices = @transform_7, window_bounds = array<i64: 1, 32>}, {transform_indices = @transform_8, window_bounds = array<i64: 16, 32>}, {transform_indices = @transform_9, window_bounds = array<i64: 16, 32>}]} {
    %c0 = arith.constant 0 : index
    %c0_0 = arith.constant 0 : index
    %0 = vector.load %arg1[%c0, %c0_0] : memref<16x32xf32, #tpu.memory_space<vmem>>, vector<16x32xf32>
    %c0_1 = arith.constant 0 : index
    %c0_2 = arith.constant 0 : index
    %1 = vector.load %arg2[%c0_1, %c0_2] : memref<16x32xbf16, #tpu.memory_space<vmem>>, vector<16x32xbf16>
    %c0_3 = arith.constant 0 : index
    %c0_4 = arith.constant 0 : index
    %2 = vector.load %arg3[%c0_3, %c0_4] : memref<32x32xbf16, #tpu.memory_space<vmem>>, vector<32x32xbf16>
    %cst = arith.constant dense<0.000000e+00> : vector<16x32xf32>
    %3 = tpu.matmul %1, %2, %cst {dimension_numbers = #tpu.dot_dimension_numbers<[1], [0], [0], [1], [0, 0, 1, 1], [], []>} : vector<16x32xbf16>, vector<32x32xbf16>, vector<16x32xf32> -> vector<16x32xf32>
    %4 = arith.addf %0, %3 : vector<16x32xf32>
    %c0_5 = arith.constant 0 : index
    %c0_6 = arith.constant 0 : index
    %5 = vector.load %arg4[%c0_5, %c0_6] : memref<1x32xf32, #tpu.memory_space<vmem>>, vector<1x32xf32>
    %6 = vector.broadcast %5 : vector<1x32xf32> to vector<16x32xf32>
    %7 = arith.addf %4, %6 : vector<16x32xf32>
    %c0_7 = arith.constant 0 : index
    %c0_8 = arith.constant 0 : index
    %8 = vector.load %arg5[%c0_7, %c0_8] : memref<1x32xf32, #tpu.memory_space<vmem>>, vector<1x32xf32>
    %c0_9 = arith.constant 0 : index
    %c0_10 = arith.constant 0 : index
    %9 = vector.load %arg6[%c0_9, %c0_10] : memref<1x32xf32, #tpu.memory_space<vmem>>, vector<1x32xf32>
    %cst_11 = arith.constant dense<0.000000e+00> : vector<16xf32>
    %10 = vector.multi_reduction <add>, %7, %cst_11 [1] : vector<16x32xf32> to vector<16xf32>
    %11 = vector.shape_cast %10 : vector<16xf32> to vector<16x1xf32>
    %cst_12 = arith.constant 3.200000e+01 : f32
    %12 = vector.broadcast %cst_12 : f32 to vector<16x1xf32>
    %13 = arith.divf %11, %12 : vector<16x1xf32>
    %14 = vector.broadcast %13 : vector<16x1xf32> to vector<16x32xf32>
    %15 = arith.subf %7, %14 : vector<16x32xf32>
    %16 = arith.mulf %15, %15 : vector<16x32xf32>
    %cst_13 = arith.constant dense<0.000000e+00> : vector<16xf32>
    %17 = vector.multi_reduction <add>, %16, %cst_13 [1] : vector<16x32xf32> to vector<16xf32>
    %18 = vector.shape_cast %17 : vector<16xf32> to vector<16x1xf32>
    %cst_14 = arith.constant 3.200000e+01 : f32
    %19 = vector.broadcast %cst_14 : f32 to vector<16x1xf32>
    %20 = arith.divf %18, %19 : vector<16x1xf32>
    %21 = vector.broadcast %13 : vector<16x1xf32> to vector<16x32xf32>
    %22 = arith.subf %7, %21 : vector<16x32xf32>
    %cst_15 = arith.constant 9.99999974E-6 : f32
    %23 = vector.broadcast %cst_15 : f32 to vector<16x1xf32>
    %24 = arith.addf %20, %23 : vector<16x1xf32>
    %25 = math.rsqrt %24 : vector<16x1xf32>
    %26 = vector.broadcast %25 : vector<16x1xf32> to vector<16x32xf32>
    %27 = arith.mulf %22, %26 : vector<16x32xf32>
    %28 = vector.broadcast %8 : vector<1x32xf32> to vector<16x32xf32>
    %29 = arith.mulf %27, %28 : vector<16x32xf32>
    %30 = vector.broadcast %9 : vector<1x32xf32> to vector<16x32xf32>
    %31 = arith.addf %29, %30 : vector<16x32xf32>
    %32 = arith.truncf %31 : vector<16x32xf32> to vector<16x32xbf16>
    %c0_16 = arith.constant 0 : index
    %c0_17 = arith.constant 0 : index
    %33 = vector.load %arg7[%c0_16, %c0_17] : memref<32x32xbf16, #tpu.memory_space<vmem>>, vector<32x32xbf16>
    %cst_18 = arith.constant dense<0.000000e+00> : vector<16x32xf32>
    %34 = tpu.matmul %32, %33, %cst_18 {dimension_numbers = #tpu.dot_dimension_numbers<[1], [0], [0], [1], [0, 0, 1, 1], [], []>} : vector<16x32xbf16>, vector<32x32xbf16>, vector<16x32xf32> -> vector<16x32xf32>
    %c0_19 = arith.constant 0 : index
    %c0_20 = arith.constant 0 : index
    %35 = vector.load %arg8[%c0_19, %c0_20] : memref<1x32xf32, #tpu.memory_space<vmem>>, vector<1x32xf32>
    %36 = vector.broadcast %35 : vector<1x32xf32> to vector<16x32xf32>
    %37 = arith.addf %34, %36 : vector<16x32xf32>
    %c0_21 = arith.constant 0 : index
    %c0_22 = arith.constant 0 : index
    %38 = vector.load %arg9[%c0_21, %c0_22] : memref<16x32xf32, #tpu.memory_space<vmem>>, vector<16x32xf32>
    tpu.vector_store %arg9[%c0_21, %c0_22], %7 {strides = array<i32>} : memref<16x32xf32, #tpu.memory_space<vmem>>, vector<16x32xf32>,
    %39 = arith.truncf %37 : vector<16x32xf32> to vector<16x32xbf16>
    %c0_23 = arith.constant 0 : index
    %c0_24 = arith.constant 0 : index
    %40 = vector.load %arg10[%c0_23, %c0_24] : memref<16x32xbf16, #tpu.memory_space<vmem>>, vector<16x32xbf16>
    tpu.vector_store %arg10[%c0_23, %c0_24], %39 {strides = array<i32>} : memref<16x32xbf16, #tpu.memory_space<vmem>>, vector<16x32xbf16>,
    return
  }
  func.func @transform_0(%arg0: i32) -> (i32, i32) {
    %c0_i32 = arith.constant 0 : i32
    %c0_i32_0 = arith.constant 0 : i32
    return %arg0, %c0_i32 : i32, i32
  }
  func.func @transform_1(%arg0: i32) -> (i32, i32) {
    %c0_i32 = arith.constant 0 : i32
    %c0_i32_0 = arith.constant 0 : i32
    return %arg0, %c0_i32 : i32, i32
  }
  func.func @transform_2(%arg0: i32) -> (i32, i32) {
    %c0_i32 = arith.constant 0 : i32
    %c0_i32_0 = arith.constant 0 : i32
    %c0_i32_1 = arith.constant 0 : i32
    return %c0_i32, %c0_i32_0 : i32, i32
  }
  func.func @transform_3(%arg0: i32) -> (i32, i32) {
    %c0_i32 = arith.constant 0 : i32
    %c0_i32_0 = arith.constant 0 : i32
    %c0_i32_1 = arith.constant 0 : i32
    return %c0_i32, %c0_i32_0 : i32, i32
  }
  func.func @transform_4(%arg0: i32) -> (i32, i32) {
    %c0_i32 = arith.constant 0 : i32
    %c0_i32_0 = arith.constant 0 : i32
    %c0_i32_1 = arith.constant 0 : i32
    return %c0_i32, %c0_i32_0 : i32, i32
  }
  func.func @transform_5(%arg0: i32) -> (i32, i32) {
    %c0_i32 = arith.constant 0 : i32
    %c0_i32_0 = arith.constant 0 : i32
    %c0_i32_1 = arith.constant 0 : i32
    return %c0_i32, %c0_i32_0 : i32, i32
  }
  func.func @transform_6(%arg0: i32) -> (i32, i32) {
    %c0_i32 = arith.constant 0 : i32
    %c0_i32_0 = arith.constant 0 : i32
    %c0_i32_1 = arith.constant 0 : i32
    return %c0_i32, %c0_i32_0 : i32, i32
  }
  func.func @transform_7(%arg0: i32) -> (i32, i32) {
    %c0_i32 = arith.constant 0 : i32
    %c0_i32_0 = arith.constant 0 : i32
    %c0_i32_1 = arith.constant 0 : i32
    return %c0_i32, %c0_i32_0 : i32, i32
  }
  func.func @transform_8(%arg0: i32) -> (i32, i32) {
    %c0_i32 = arith.constant 0 : i32
    %c0_i32_0 = arith.constant 0 : i32
    return %arg0, %c0_i32 : i32, i32
  }
  func.func @transform_9(%arg0: i32) -> (i32, i32) {
    %c0_i32 = arith.constant 0 : i32
    %c0_i32_0 = arith.constant 0 : i32
    return %arg0, %c0_i32 : i32, i32
  }
}

module attributes {stable_mosaic.version = 11 : i64} {
  func.func @_kv_proj_kernel(%arg0: i32, %arg1: memref<16x32xf32, #tpu.memory_space<vmem>>, %arg2: memref<32x64xbf16, #tpu.memory_space<vmem>>, %arg3: memref<1x64xf32, #tpu.memory_space<vmem>>, %arg4: memref<16x64xbf16, #tpu.memory_space<vmem>>) attributes {dimension_semantics = [#tpu.dimension_semantics<parallel>], iteration_bounds = array<i64: 1>, scalar_prefetch = 0 : i64, scratch_operands = 0 : i64, tpu.core_type = #tpu.core_type<tc>, window_params = [{transform_indices = @transform_0, window_bounds = array<i64: 16, 32>}, {pipeline_mode = #tpu.pipeline_mode<synchronous>, transform_indices = @transform_1, window_bounds = array<i64: 32, 64>}, {pipeline_mode = #tpu.pipeline_mode<synchronous>, transform_indices = @transform_2, window_bounds = array<i64: 1, 64>}, {transform_indices = @transform_3, window_bounds = array<i64: 16, 64>}]} {
    %c0 = arith.constant 0 : index
    %c0_0 = arith.constant 0 : index
    %0 = vector.load %arg1[%c0, %c0_0] : memref<16x32xf32, #tpu.memory_space<vmem>>, vector<16x32xf32>
    %1 = arith.truncf %0 : vector<16x32xf32> to vector<16x32xbf16>
    %c0_1 = arith.constant 0 : index
    %c0_2 = arith.constant 0 : index
    %2 = vector.load %arg2[%c0_1, %c0_2] : memref<32x64xbf16, #tpu.memory_space<vmem>>, vector<32x64xbf16>
    %cst = arith.constant dense<0.000000e+00> : vector<16x64xf32>
    %3 = tpu.matmul %1, %2, %cst {dimension_numbers = #tpu.dot_dimension_numbers<[1], [0], [0], [1], [0, 0, 1, 1], [], []>} : vector<16x32xbf16>, vector<32x64xbf16>, vector<16x64xf32> -> vector<16x64xf32>
    %c0_3 = arith.constant 0 : index
    %c0_4 = arith.constant 0 : index
    %4 = vector.load %arg3[%c0_3, %c0_4] : memref<1x64xf32, #tpu.memory_space<vmem>>, vector<1x64xf32>
    %5 = vector.broadcast %4 : vector<1x64xf32> to vector<16x64xf32>
    %6 = arith.addf %3, %5 : vector<16x64xf32>
    %7 = arith.truncf %6 : vector<16x64xf32> to vector<16x64xbf16>
    %c0_5 = arith.constant 0 : index
    %c0_6 = arith.constant 0 : index
    %8 = vector.load %arg4[%c0_5, %c0_6] : memref<16x64xbf16, #tpu.memory_space<vmem>>, vector<16x64xbf16>
    tpu.vector_store %arg4[%c0_5, %c0_6], %7 {strides = array<i32>} : memref<16x64xbf16, #tpu.memory_space<vmem>>, vector<16x64xbf16>,
    return
  }
  func.func @transform_0(%arg0: i32) -> (i32, i32) {
    %c0_i32 = arith.constant 0 : i32
    %c0_i32_0 = arith.constant 0 : i32
    return %arg0, %c0_i32 : i32, i32
  }
  func.func @transform_1(%arg0: i32) -> (i32, i32) {
    %c0_i32 = arith.constant 0 : i32
    %c0_i32_0 = arith.constant 0 : i32
    %c0_i32_1 = arith.constant 0 : i32
    return %c0_i32, %c0_i32_0 : i32, i32
  }
  func.func @transform_2(%arg0: i32) -> (i32, i32) {
    %c0_i32 = arith.constant 0 : i32
    %c0_i32_0 = arith.constant 0 : i32
    %c0_i32_1 = arith.constant 0 : i32
    return %c0_i32, %c0_i32_0 : i32, i32
  }
  func.func @transform_3(%arg0: i32) -> (i32, i32) {
    %c0_i32 = arith.constant 0 : i32
    %c0_i32_0 = arith.constant 0 : i32
    return %arg0, %c0_i32 : i32, i32
  }
}

module attributes {stable_mosaic.version = 11 : i64} {
  func.func @_proj_ffn_kernel(%arg0: i32, %arg1: memref<16x32xf32, #tpu.memory_space<vmem>>, %arg2: memref<16x32xbf16, #tpu.memory_space<vmem>>, %arg3: memref<32x32xbf16, #tpu.memory_space<vmem>>, %arg4: memref<1x32xf32, #tpu.memory_space<vmem>>, %arg5: memref<1x32xf32, #tpu.memory_space<vmem>>, %arg6: memref<1x32xf32, #tpu.memory_space<vmem>>, %arg7: memref<32x64xbf16, #tpu.memory_space<vmem>>, %arg8: memref<1x64xf32, #tpu.memory_space<vmem>>, %arg9: memref<64x32xbf16, #tpu.memory_space<vmem>>, %arg10: memref<1x32xf32, #tpu.memory_space<vmem>>, %arg11: memref<16x32xf32, #tpu.memory_space<vmem>>) attributes {dimension_semantics = [#tpu.dimension_semantics<parallel>], iteration_bounds = array<i64: 1>, scalar_prefetch = 0 : i64, scratch_operands = 0 : i64, tpu.core_type = #tpu.core_type<tc>, window_params = [{transform_indices = @transform_0, window_bounds = array<i64: 16, 32>}, {transform_indices = @transform_1, window_bounds = array<i64: 16, 32>}, {pipeline_mode = #tpu.pipeline_mode<synchronous>, transform_indices = @transform_2, window_bounds = array<i64: 32, 32>}, {pipeline_mode = #tpu.pipeline_mode<synchronous>, transform_indices = @transform_3, window_bounds = array<i64: 1, 32>}, {pipeline_mode = #tpu.pipeline_mode<synchronous>, transform_indices = @transform_4, window_bounds = array<i64: 1, 32>}, {pipeline_mode = #tpu.pipeline_mode<synchronous>, transform_indices = @transform_5, window_bounds = array<i64: 1, 32>}, {pipeline_mode = #tpu.pipeline_mode<synchronous>, transform_indices = @transform_6, window_bounds = array<i64: 32, 64>}, {pipeline_mode = #tpu.pipeline_mode<synchronous>, transform_indices = @transform_7, window_bounds = array<i64: 1, 64>}, {pipeline_mode = #tpu.pipeline_mode<synchronous>, transform_indices = @transform_8, window_bounds = array<i64: 64, 32>}, {pipeline_mode = #tpu.pipeline_mode<synchronous>, transform_indices = @transform_9, window_bounds = array<i64: 1, 32>}, {transform_indices = @transform_10, window_bounds = array<i64: 16, 32>}]} {
    %c0 = arith.constant 0 : index
    %c0_0 = arith.constant 0 : index
    %0 = vector.load %arg1[%c0, %c0_0] : memref<16x32xf32, #tpu.memory_space<vmem>>, vector<16x32xf32>
    %c0_1 = arith.constant 0 : index
    %c0_2 = arith.constant 0 : index
    %1 = vector.load %arg2[%c0_1, %c0_2] : memref<16x32xbf16, #tpu.memory_space<vmem>>, vector<16x32xbf16>
    %c0_3 = arith.constant 0 : index
    %c0_4 = arith.constant 0 : index
    %2 = vector.load %arg3[%c0_3, %c0_4] : memref<32x32xbf16, #tpu.memory_space<vmem>>, vector<32x32xbf16>
    %cst = arith.constant dense<0.000000e+00> : vector<16x32xf32>
    %3 = tpu.matmul %1, %2, %cst {dimension_numbers = #tpu.dot_dimension_numbers<[1], [0], [0], [1], [0, 0, 1, 1], [], []>} : vector<16x32xbf16>, vector<32x32xbf16>, vector<16x32xf32> -> vector<16x32xf32>
    %4 = arith.addf %0, %3 : vector<16x32xf32>
    %c0_5 = arith.constant 0 : index
    %c0_6 = arith.constant 0 : index
    %5 = vector.load %arg4[%c0_5, %c0_6] : memref<1x32xf32, #tpu.memory_space<vmem>>, vector<1x32xf32>
    %6 = vector.broadcast %5 : vector<1x32xf32> to vector<16x32xf32>
    %7 = arith.addf %4, %6 : vector<16x32xf32>
    %c0_7 = arith.constant 0 : index
    %c0_8 = arith.constant 0 : index
    %8 = vector.load %arg5[%c0_7, %c0_8] : memref<1x32xf32, #tpu.memory_space<vmem>>, vector<1x32xf32>
    %c0_9 = arith.constant 0 : index
    %c0_10 = arith.constant 0 : index
    %9 = vector.load %arg6[%c0_9, %c0_10] : memref<1x32xf32, #tpu.memory_space<vmem>>, vector<1x32xf32>
    %cst_11 = arith.constant dense<0.000000e+00> : vector<16xf32>
    %10 = vector.multi_reduction <add>, %7, %cst_11 [1] : vector<16x32xf32> to vector<16xf32>
    %11 = vector.shape_cast %10 : vector<16xf32> to vector<16x1xf32>
    %cst_12 = arith.constant 3.200000e+01 : f32
    %12 = vector.broadcast %cst_12 : f32 to vector<16x1xf32>
    %13 = arith.divf %11, %12 : vector<16x1xf32>
    %14 = vector.broadcast %13 : vector<16x1xf32> to vector<16x32xf32>
    %15 = arith.subf %7, %14 : vector<16x32xf32>
    %16 = arith.mulf %15, %15 : vector<16x32xf32>
    %cst_13 = arith.constant dense<0.000000e+00> : vector<16xf32>
    %17 = vector.multi_reduction <add>, %16, %cst_13 [1] : vector<16x32xf32> to vector<16xf32>
    %18 = vector.shape_cast %17 : vector<16xf32> to vector<16x1xf32>
    %cst_14 = arith.constant 3.200000e+01 : f32
    %19 = vector.broadcast %cst_14 : f32 to vector<16x1xf32>
    %20 = arith.divf %18, %19 : vector<16x1xf32>
    %21 = vector.broadcast %13 : vector<16x1xf32> to vector<16x32xf32>
    %22 = arith.subf %7, %21 : vector<16x32xf32>
    %cst_15 = arith.constant 9.99999974E-6 : f32
    %23 = vector.broadcast %cst_15 : f32 to vector<16x1xf32>
    %24 = arith.addf %20, %23 : vector<16x1xf32>
    %25 = math.rsqrt %24 : vector<16x1xf32>
    %26 = vector.broadcast %25 : vector<16x1xf32> to vector<16x32xf32>
    %27 = arith.mulf %22, %26 : vector<16x32xf32>
    %28 = vector.broadcast %8 : vector<1x32xf32> to vector<16x32xf32>
    %29 = arith.mulf %27, %28 : vector<16x32xf32>
    %30 = vector.broadcast %9 : vector<1x32xf32> to vector<16x32xf32>
    %31 = arith.addf %29, %30 : vector<16x32xf32>
    %32 = arith.truncf %31 : vector<16x32xf32> to vector<16x32xbf16>
    %c0_16 = arith.constant 0 : index
    %c0_17 = arith.constant 0 : index
    %33 = vector.load %arg7[%c0_16, %c0_17] : memref<32x64xbf16, #tpu.memory_space<vmem>>, vector<32x64xbf16>
    %cst_18 = arith.constant dense<0.000000e+00> : vector<16x64xf32>
    %34 = tpu.matmul %32, %33, %cst_18 {dimension_numbers = #tpu.dot_dimension_numbers<[1], [0], [0], [1], [0, 0, 1, 1], [], []>} : vector<16x32xbf16>, vector<32x64xbf16>, vector<16x64xf32> -> vector<16x64xf32>
    %c0_19 = arith.constant 0 : index
    %c0_20 = arith.constant 0 : index
    %35 = vector.load %arg8[%c0_19, %c0_20] : memref<1x64xf32, #tpu.memory_space<vmem>>, vector<1x64xf32>
    %36 = vector.broadcast %35 : vector<1x64xf32> to vector<16x64xf32>
    %37 = arith.addf %34, %36 : vector<16x64xf32>
    %cst_21 = arith.constant 0.000000e+00 : f32
    %38 = vector.broadcast %cst_21 : f32 to vector<16x64xf32>
    %39 = arith.maximumf %37, %38 : vector<16x64xf32>
    %40 = arith.truncf %39 : vector<16x64xf32> to vector<16x64xbf16>
    %c0_22 = arith.constant 0 : index
    %c0_23 = arith.constant 0 : index
    %41 = vector.load %arg9[%c0_22, %c0_23] : memref<64x32xbf16, #tpu.memory_space<vmem>>, vector<64x32xbf16>
    %cst_24 = arith.constant dense<0.000000e+00> : vector<16x32xf32>
    %42 = tpu.matmul %40, %41, %cst_24 {dimension_numbers = #tpu.dot_dimension_numbers<[1], [0], [0], [1], [0, 0, 1, 1], [], []>} : vector<16x64xbf16>, vector<64x32xbf16>, vector<16x32xf32> -> vector<16x32xf32>
    %43 = arith.addf %7, %42 : vector<16x32xf32>
    %c0_25 = arith.constant 0 : index
    %c0_26 = arith.constant 0 : index
    %44 = vector.load %arg10[%c0_25, %c0_26] : memref<1x32xf32, #tpu.memory_space<vmem>>, vector<1x32xf32>
    %45 = vector.broadcast %44 : vector<1x32xf32> to vector<16x32xf32>
    %46 = arith.addf %43, %45 : vector<16x32xf32>
    %c0_27 = arith.constant 0 : index
    %c0_28 = arith.constant 0 : index
    %47 = vector.load %arg11[%c0_27, %c0_28] : memref<16x32xf32, #tpu.memory_space<vmem>>, vector<16x32xf32>
    tpu.vector_store %arg11[%c0_27, %c0_28], %46 {strides = array<i32>} : memref<16x32xf32, #tpu.memory_space<vmem>>, vector<16x32xf32>,
    return
  }
  func.func @transform_0(%arg0: i32) -> (i32, i32) {
    %c0_i32 = arith.constant 0 : i32
    %c0_i32_0 = arith.constant 0 : i32
    return %arg0, %c0_i32 : i32, i32
  }
  func.func @transform_1(%arg0: i32) -> (i32, i32) {
    %c0_i32 = arith.constant 0 : i32
    %c0_i32_0 = arith.constant 0 : i32
    return %arg0, %c0_i32 : i32, i32
  }
  func.func @transform_2(%arg0: i32) -> (i32, i32) {
    %c0_i32 = arith.constant 0 : i32
    %c0_i32_0 = arith.constant 0 : i32
    %c0_i32_1 = arith.constant 0 : i32
    return %c0_i32, %c0_i32_0 : i32, i32
  }
  func.func @transform_3(%arg0: i32) -> (i32, i32) {
    %c0_i32 = arith.constant 0 : i32
    %c0_i32_0 = arith.constant 0 : i32
    %c0_i32_1 = arith.constant 0 : i32
    return %c0_i32, %c0_i32_0 : i32, i32
  }
  func.func @transform_4(%arg0: i32) -> (i32, i32) {
    %c0_i32 = arith.constant 0 : i32
    %c0_i32_0 = arith.constant 0 : i32
    %c0_i32_1 = arith.constant 0 : i32
    return %c0_i32, %c0_i32_0 : i32, i32
  }
  func.func @transform_5(%arg0: i32) -> (i32, i32) {
    %c0_i32 = arith.constant 0 : i32
    %c0_i32_0 = arith.constant 0 : i32
    %c0_i32_1 = arith.constant 0 : i32
    return %c0_i32, %c0_i32_0 : i32, i32
  }
  func.func @transform_6(%arg0: i32) -> (i32, i32) {
    %c0_i32 = arith.constant 0 : i32
    %c0_i32_0 = arith.constant 0 : i32
    %c0_i32_1 = arith.constant 0 : i32
    return %c0_i32, %c0_i32_0 : i32, i32
  }
  func.func @transform_7(%arg0: i32) -> (i32, i32) {
    %c0_i32 = arith.constant 0 : i32
    %c0_i32_0 = arith.constant 0 : i32
    %c0_i32_1 = arith.constant 0 : i32
    return %c0_i32, %c0_i32_0 : i32, i32
  }
  func.func @transform_8(%arg0: i32) -> (i32, i32) {
    %c0_i32 = arith.constant 0 : i32
    %c0_i32_0 = arith.constant 0 : i32
    %c0_i32_1 = arith.constant 0 : i32
    return %c0_i32, %c0_i32_0 : i32, i32
  }
  func.func @transform_9(%arg0: i32) -> (i32, i32) {
    %c0_i32 = arith.constant 0 : i32
    %c0_i32_0 = arith.constant 0 : i32
    %c0_i32_1 = arith.constant 0 : i32
    return %c0_i32, %c0_i32_0 : i32, i32
  }
  func.func @transform_10(%arg0: i32) -> (i32, i32) {
    %c0_i32 = arith.constant 0 : i32
    %c0_i32_0 = arith.constant 0 : i32
    return %arg0, %c0_i32 : i32, i32
  }
}

module attributes {stable_mosaic.version = 11 : i64} {
  func.func @_fc_kernel(%arg0: i32, %arg1: i32, %arg2: memref<16x32xf32, #tpu.memory_space<vmem>>, %arg3: memref<32x50xbf16, #tpu.memory_space<vmem>>, %arg4: memref<1x50xf32, #tpu.memory_space<vmem>>, %arg5: memref<16x50xf32, #tpu.memory_space<vmem>>) attributes {dimension_semantics = [#tpu.dimension_semantics<parallel>, #tpu.dimension_semantics<parallel>], iteration_bounds = array<i64: 1, 1>, scalar_prefetch = 0 : i64, scratch_operands = 0 : i64, tpu.core_type = #tpu.core_type<tc>, window_params = [{transform_indices = @transform_0, window_bounds = array<i64: 16, 32>}, {transform_indices = @transform_1, window_bounds = array<i64: 32, 50>}, {transform_indices = @transform_2, window_bounds = array<i64: 1, 50>}, {transform_indices = @transform_3, window_bounds = array<i64: 16, 50>}]} {
    %c0 = arith.constant 0 : index
    %c0_0 = arith.constant 0 : index
    %0 = vector.load %arg2[%c0, %c0_0] : memref<16x32xf32, #tpu.memory_space<vmem>>, vector<16x32xf32>
    %1 = arith.truncf %0 : vector<16x32xf32> to vector<16x32xbf16>
    %c0_1 = arith.constant 0 : index
    %c0_2 = arith.constant 0 : index
    %2 = vector.load %arg3[%c0_1, %c0_2] : memref<32x50xbf16, #tpu.memory_space<vmem>>, vector<32x50xbf16>
    %cst = arith.constant dense<0.000000e+00> : vector<16x50xf32>
    %3 = tpu.matmul %1, %2, %cst {dimension_numbers = #tpu.dot_dimension_numbers<[1], [0], [0], [1], [0, 0, 1, 1], [], []>} : vector<16x32xbf16>, vector<32x50xbf16>, vector<16x50xf32> -> vector<16x50xf32>
    %c0_3 = arith.constant 0 : index
    %c0_4 = arith.constant 0 : index
    %4 = vector.load %arg4[%c0_3, %c0_4] : memref<1x50xf32, #tpu.memory_space<vmem>>, vector<1x50xf32>
    %5 = vector.broadcast %4 : vector<1x50xf32> to vector<16x50xf32>
    %6 = arith.addf %3, %5 : vector<16x50xf32>
    %c0_5 = arith.constant 0 : index
    %c0_6 = arith.constant 0 : index
    %7 = vector.load %arg5[%c0_5, %c0_6] : memref<16x50xf32, #tpu.memory_space<vmem>>, vector<16x50xf32>
    tpu.vector_store %arg5[%c0_5, %c0_6], %6 {strides = array<i32>} : memref<16x50xf32, #tpu.memory_space<vmem>>, vector<16x50xf32>,
    return
  }
  func.func @transform_0(%arg0: i32, %arg1: i32) -> (i32, i32) {
    %c0_i32 = arith.constant 0 : i32
    %c0_i32_0 = arith.constant 0 : i32
    return %arg0, %c0_i32 : i32, i32
  }
  func.func @transform_1(%arg0: i32, %arg1: i32) -> (i32, i32) {
    %c0_i32 = arith.constant 0 : i32
    %c0_i32_0 = arith.constant 0 : i32
    return %c0_i32, %arg1 : i32, i32
  }
  func.func @transform_2(%arg0: i32, %arg1: i32) -> (i32, i32) {
    %c0_i32 = arith.constant 0 : i32
    %c0_i32_0 = arith.constant 0 : i32
    return %c0_i32, %arg1 : i32, i32
  }
  func.func @transform_3(%arg0: i32, %arg1: i32) -> (i32, i32) {
    %c0_i32 = arith.constant 0 : i32
    return %arg0, %arg1 : i32, i32
  }
}

module attributes {stable_mosaic.version = 11 : i64} {
  func.func @_mha_kernel(%arg0: i32, %arg1: i32, %arg2: memref<1x8x8xbf16, #tpu.memory_space<vmem>>, %arg3: memref<1x8x8xbf16, #tpu.memory_space<vmem>>, %arg4: memref<1x8x8xbf16, #tpu.memory_space<vmem>>, %arg5: memref<1x8x8xbf16, #tpu.memory_space<vmem>>) attributes {dimension_semantics = [#tpu.dimension_semantics<parallel>, #tpu.dimension_semantics<parallel>], iteration_bounds = array<i64: 8, 1>, scalar_prefetch = 0 : i64, scratch_operands = 0 : i64, tpu.core_type = #tpu.core_type<tc>, window_params = [{transform_indices = @transform_0, window_bounds = array<i64: 1, 8, 8>}, {transform_indices = @transform_1, window_bounds = array<i64: 1, 8, 8>}, {transform_indices = @transform_2, window_bounds = array<i64: 1, 8, 8>}, {transform_indices = @transform_3, window_bounds = array<i64: 1, 8, 8>}]} {
    %c0 = arith.constant 0 : index
    %c0_0 = arith.constant 0 : index
    %c0_1 = arith.constant 0 : index
    %0 = vector.load %arg2[%c0, %c0_0, %c0_1] : memref<1x8x8xbf16, #tpu.memory_space<vmem>>, vector<1x8x8xbf16>
    %1 = vector.shape_cast %0 : vector<1x8x8xbf16> to vector<8x8xbf16>
    %2 = arith.extf %1 : vector<8x8xbf16> to vector<8x8xf32>
    %cst = arith.constant 0.353553385 : f32
    %3 = vector.broadcast %cst : f32 to vector<8x8xf32>
    %4 = arith.mulf %2, %3 : vector<8x8xf32>
    %5 = arith.truncf %4 : vector<8x8xf32> to vector<8x8xbf16>
    %c0_2 = arith.constant 0 : index
    %c0_3 = arith.constant 0 : index
    %c0_4 = arith.constant 0 : index
    %6 = vector.load %arg3[%c0_2, %c0_3, %c0_4] : memref<1x8x8xbf16, #tpu.memory_space<vmem>>, vector<1x8x8xbf16>
    %7 = vector.shape_cast %6 : vector<1x8x8xbf16> to vector<8x8xbf16>
    %cst_5 = arith.constant dense<0.000000e+00> : vector<8x8xf32>
    %8 = tpu.matmul %5, %7, %cst_5 {dimension_numbers = #tpu.dot_dimension_numbers<[1], [1], [0], [0], [0, 0, 1, 0], [], []>} : vector<8x8xbf16>, vector<8x8xbf16>, vector<8x8xf32> -> vector<8x8xf32>
    %cst_6 = arith.constant dense<0xFF800000> : vector<8xf32>
    %9 = vector.multi_reduction <maximumf>, %8, %cst_6 [1] : vector<8x8xf32> to vector<8xf32>
    %10 = vector.shape_cast %9 : vector<8xf32> to vector<8x1xf32>
    %11 = vector.broadcast %10 : vector<8x1xf32> to vector<8x8xf32>
    %12 = arith.subf %8, %11 : vector<8x8xf32>
    %13 = math.exp %12 : vector<8x8xf32>
    %cst_7 = arith.constant dense<0.000000e+00> : vector<8xf32>
    %14 = vector.multi_reduction <add>, %13, %cst_7 [1] : vector<8x8xf32> to vector<8xf32>
    %15 = vector.shape_cast %14 : vector<8xf32> to vector<8x1xf32>
    %16 = arith.truncf %13 : vector<8x8xf32> to vector<8x8xbf16>
    %c0_8 = arith.constant 0 : index
    %c0_9 = arith.constant 0 : index
    %c0_10 = arith.constant 0 : index
    %17 = vector.load %arg4[%c0_8, %c0_9, %c0_10] : memref<1x8x8xbf16, #tpu.memory_space<vmem>>, vector<1x8x8xbf16>
    %18 = vector.shape_cast %17 : vector<1x8x8xbf16> to vector<8x8xbf16>
    %cst_11 = arith.constant dense<0.000000e+00> : vector<8x8xf32>
    %19 = tpu.matmul %16, %18, %cst_11 {dimension_numbers = #tpu.dot_dimension_numbers<[1], [0], [0], [1], [0, 0, 1, 1], [], []>} : vector<8x8xbf16>, vector<8x8xbf16>, vector<8x8xf32> -> vector<8x8xf32>
    %20 = tpu.reciprocal %15 {approx = true} : vector<8x1xf32> -> vector<8x1xf32>
    %21 = vector.broadcast %20 : vector<8x1xf32> to vector<8x8xf32>
    %22 = arith.mulf %19, %21 : vector<8x8xf32>
    %23 = arith.truncf %22 : vector<8x8xf32> to vector<8x8xbf16>
    %c0_12 = arith.constant 0 : index
    %c0_13 = arith.constant 0 : index
    %c0_14 = arith.constant 0 : index
    %24 = vector.load %arg5[%c0_12, %c0_13, %c0_14] : memref<1x8x8xbf16, #tpu.memory_space<vmem>>, vector<1x8x8xbf16>
    %25 = vector.shape_cast %24 : vector<1x8x8xbf16> to vector<8x8xbf16>
    %26 = vector.shape_cast %23 : vector<8x8xbf16> to vector<1x8x8xbf16>
    tpu.vector_store %arg5[%c0_12, %c0_13, %c0_14], %26 {strides = array<i32>} : memref<1x8x8xbf16, #tpu.memory_space<vmem>>, vector<1x8x8xbf16>,
    return
  }
  func.func @transform_0(%arg0: i32, %arg1: i32) -> (i32, i32, i32) {
    %c0_i32 = arith.constant 0 : i32
    %c0_i32_0 = arith.constant 0 : i32
    return %arg0, %arg1, %c0_i32 : i32, i32, i32
  }
  func.func @transform_1(%arg0: i32, %arg1: i32) -> (i32, i32, i32) {
    %c0_i32 = arith.constant 0 : i32
    %c0_i32_0 = arith.constant 0 : i32
    %c0_i32_1 = arith.constant 0 : i32
    return %arg0, %c0_i32, %c0_i32_0 : i32, i32, i32
  }
  func.func @transform_2(%arg0: i32, %arg1: i32) -> (i32, i32, i32) {
    %c0_i32 = arith.constant 0 : i32
    %c0_i32_0 = arith.constant 0 : i32
    %c0_i32_1 = arith.constant 0 : i32
    return %arg0, %c0_i32, %c0_i32_0 : i32, i32, i32
  }
  func.func @transform_3(%arg0: i32, %arg1: i32) -> (i32, i32, i32) {
    %c0_i32 = arith.constant 0 : i32
    %c0_i32_0 = arith.constant 0 : i32
    return %arg0, %arg1, %c0_i32 : i32, i32, i32
  }
}

</mosaic_0001>

<bundles_post_ra>
// kernel: transformer_forward.29
= control target key start
LH: loop header
LB: loop body
LE: loop exit
PB: predicated region body
PF: predicated region fallthrough
CT: control target
= control target key end

     0   :  { %vm25_vm0 = vcmask 261120   ;;  %v181_v15 = vmov 0.0   ;;  %vm182_vm1 = vmmov 0   ;;  %vm145_vm2 = vcmask 781312   ;;  %s245_s0 = inlined_call_operand.vmem [shape: f32[16,32], index: 0, kind: input, shape index: {}]   ;;  %s246_s1 = inlined_call_operand.vmem [shape: bf16[32,96], index: 1, kind: input, shape index: {}]   ;;  %s247_s3 = inlined_call_operand.vmem [shape: f32[1,32], index: 3, kind: input, shape index: {}]   ;;  %s248_s4 = inlined_call_operand.vmem [shape: f32[1,32], index: 4, kind: input, shape index: {}]   ;;  %s249_s2 = inlined_call_operand.vmem [shape: f32[1,96], index: 2, kind: input, shape index: {}]   ;;  %s250_s5 = inlined_call_operand.vmem [shape: bf16[16,96], index: 5, kind: output, shape index: {}]  }
   0x1   :  { %v21_v0 = vld [vmem:[%s245_s0] sm:$0xff]  ;;  %v22_v1 = vld [vmem:[%s245_s0 + $0x8] sm:$0xff]  ;;  %165 = vmatprep.subr.bf16.mxu0 %v181_v15  ;;  %169 = vmatprep.mubr.msk.bf16.mxu0 %vm182_vm1, %v181_v15 }
   0x2   :  { %v26_v2 = vsel %vm25_vm0, %v21_v0, 0.0  ;;  %v29_v3 = vsel %vm25_vm0, %v22_v1, 0.0  ;;  %v175_v14 = vld [vmem:[%s246_s1] sm:$0xff]   ;;  %v176_v16 = vld [vmem:[%s246_s1 + $0x8] sm:$0xff]  }
   0x3   :  { %27 = vadd.xlane.f32.xlu0 %v26_v2  ;;  %166 = vmatpush3.bf16.msra.mxu0 %v175_v14  ;;  %v152_v25 = vld [vmem:[%s247_s3] ss:$0 sm:$0xff] }
   0x4   :  { %167 = vmatprep.subr.bf16.mxu0 %v181_v15  ;;  %v153_v29 = vld [vmem:[%s248_s4] ss:$0 sm:$0xff] }
   0x5   :  { %v154_v34 = vld [vmem:[%s249_s2] ss:$0 sm:$0xff] }
   0x7   :  { %30 = vadd.xlane.f32.xlu0 %v29_v3  ;;  %168 = vmatpush3.bf16.msra.mxu0 %v176_v16 }
  0x90   :  { %v28_v4 = vpop.xlane.xlu0 %27 }
  0x91   :  { %v33_v5 = vmul.f32 0.03125, %v28_v4 }
  0x93   :  { %v35_v6 = vsub.f32 %v21_v0, %v33_v5 }
  0x94   :  { %v31_v7 = vpop.xlane.xlu0 %30 }
  0x95   :  { %v34_v8 = vmul.f32 0.03125, %v31_v7  ;;  %v37_v9 = vmul.f32 %v35_v6, %v35_v6 }
  0x97   :  { %v36_v10 = vsub.f32 %v22_v1, %v34_v8  ;;  %v39_v11 = vsel %vm25_vm0, %v37_v9, 0.0 }
  0x98   :  { %40 = vadd.xlane.f32.xlu1 %v39_v11 }
  0x99   :  { %v38_v12 = vmul.f32 %v36_v10, %v36_v10 }
  0x9b   :  { %v42_v13 = vsel %vm25_vm0, %v38_v12, 0.0 }
  0x9c   :  { %43 = vadd.xlane.f32.xlu1 %v42_v13 }
 0x125   :  { %v41_v17 = vpop.xlane.xlu1 %40 }
 0x126   :  { %v45_v18 = vmul.f32 0.03125, %v41_v17 }
 0x128   :  { %v47_v19 = vadd.f32 1e-05, %v45_v18 }
 0x129   :  { %v44_v20 = vpop.xlane.xlu1 %43 }
 0x12a   :  { %177 = vrsqrt.f32 %v47_v19  ;;  %v46_v21 = vmul.f32 0.03125, %v44_v20 }
 0x12c   :  { %v48_v22 = vadd.f32 1e-05, %v46_v21 }
 0x12e   :  { %179 = vrsqrt.f32 %v48_v22 }
 0x134   :  { %v178_v23 = vpop.eup %177 }
 0x135   :  { %v51_v24 = vmul.f32 %v178_v23, %v35_v6 }
 0x137   :  { %v59_v28 = vmul.f32 %v152_v25, %v51_v24 }
 0x138   :  { %v180_v26 = vpop.eup %179 }
 0x139   :  { %v52_v27 = vmul.f32 %v180_v26, %v36_v10  ;;  %v67_v31 = vadd.f32 %v153_v29, %v59_v28 }
 0x13b   :  { %v60_v30 = vmul.f32 %v152_v25, %v52_v27 }
 0x13d   :  { %v68_v32 = vadd.f32 %v153_v29, %v60_v30 }
 0x13f   :  { %v69_v33 = vpack.c.bf16 %v68_v32, %v67_v31 }
 0x141   :  { %170 = vmatmul.mubr.msk.bf16.vlgmr.msra.gmra.mrb[0].mxu0 %vm25_vm0, %v69_v33 }
 0x214   :  { %v130_v35 = vpop.f32.mrb[0].mxu0 }
 0x215   :  { %v131_v36 = vadd.f32 %v154_v34, %v130_v35  ;;  %v171_v37 = vpop.f32.mrb[1].mxu0 }
 0x216   :  { %v133_v38 = vpop.f32.mrb[2].mxu0 }
 0x217   :  { %v160_v39 = vpack.c.bf16 %v131_v36, %v131_v36  ;;  %v134_v40 = vadd.f32 %v154_v34, %v133_v38  ;;  %v172_v41 = vpop.f32.mrb[3].mxu0 }
 0x219   :  { %146 = vst.msk [vmem:[%s250_s5] sm:$0xf] %vm145_vm2, %v160_v39  ;;  %v161_v42 = vpack.c.bf16 %v134_v40, %v134_v40 }
 0x21b   :  { %147 = vst.msk [vmem:[%s250_s5 + $0x4] sm:$0xf] %vm145_vm2, %v161_v42 }

// kernel: transformer_forward.28
= control target key start
LH: loop header
LB: loop body
LE: loop exit
PB: predicated region body
PF: predicated region fallthrough
CT: control target
= control target key end

     0   :  { %v222_v0 = vmov 0.0   ;;  %vm223_vm0 = vmmov 0   ;;  %vm47_vm1 = vcmask 261120   ;;  %s288_s3 = inlined_call_operand.vmem [shape: bf16[32,32], index: 3, kind: input, shape index: {}]   ;;  %s289_s0 = inlined_call_operand.vmem [shape: f32[16,32], index: 0, kind: input, shape index: {}]   ;;  %s290_s1 = inlined_call_operand.vmem [shape: bf16[32,32], index: 1, kind: input, shape index: {}]   ;;  %s291_s4 = inlined_call_operand.vmem [shape: f32[1,32], index: 4, kind: input, shape index: {}]   ;;  %s292_s2 = inlined_call_operand.vmem [shape: f32[1,32], index: 2, kind: input, shape index: {}]   ;;  %s293_s5 = inlined_call_operand.vmem [shape: f32[16,32], index: 5, kind: output, shape index: {}]  }
   0x1   :  { %200 = vmatprep.subr.bf16.mxu1 %v222_v0  ;;  %v210_v1 = vld [vmem:[%s288_s3] sm:$0xff]   ;;  %204 = vmatprep.mubr.msk.bf16.mxu1 %vm223_vm0, %v222_v0  ;;  %v211_v2 = vld [vmem:[%s288_s3 + $0x8] sm:$0xff]  }
   0x2   :  { %192 = vmatprep.subr.bf16.mxu0 %v222_v0  ;;  %196 = vmatprep.mubr.msk.bf16.mxu0 %vm223_vm0, %v222_v0  ;;  %v21_v3 = vld [vmem:[%s289_s0] sm:$0xff]  ;;  %v22_v4 = vld [vmem:[%s289_s0 + $0x8] sm:$0xff] }
   0x3   :  { %201 = vmatpush3.bf16.msra.mxu1 %v210_v1  ;;  %v212_v5 = vld [vmem:[%s290_s1] sm:$0xff]   ;;  %v23_v6 = vpack.c.bf16 %v22_v4, %v21_v3  ;;  %v213_v7 = vld [vmem:[%s290_s1 + $0x8] sm:$0xff]  }
   0x4   :  { %202 = vmatprep.subr.bf16.mxu1 %v222_v0  ;;  %193 = vmatpush3.bf16.msra.mxu0 %v212_v5  ;;  %v180_v8 = vld [vmem:[%s291_s4] ss:$0 sm:$0xff] }
   0x5   :  { %194 = vmatprep.subr.bf16.mxu0 %v222_v0  ;;  %v176_v25 = vld [vmem:[%s292_s2] ss:$0 sm:$0xff] }
   0x7   :  { %203 = vmatpush3.bf16.msra.mxu1 %v211_v2 }
   0x8   :  { %195 = vmatpush3.bf16.msra.mxu0 %v213_v7 }
   0xa   :  { %205 = vmatmul.mubr.msk.bf16.vlgmr.msra.gmra.mrb[0].mxu1 %vm47_vm1, %v23_v6 }
   0xb   :  { %197 = vmatmul.mubr.msk.bf16.vlgmr.msra.gmra.mrb[0].mxu0 %vm47_vm1, %v23_v6 }
  0xdd   :  { %v149_v9 = vpop.f32.mrb[0].mxu1 }
  0xde   :  { %v150_v10 = vadd.f32 %v180_v8, %v149_v9  ;;  %v206_v11 = vpop.f32.mrb[1].mxu1  ;;  %v85_v16 = vpop.f32.mrb[0].mxu0 }
  0xdf   :  { %v152_v12 = vpop.f32.mrb[2].mxu1  ;;  %v198_v17 = vpop.f32.mrb[1].mxu0  ;;  %v86_v26 = vadd.f32 %v176_v25, %v85_v16 }
  0xe0   :  { %v184_v13 = vmul.f32 -1.442695, %v150_v10  ;;  %v153_v14 = vadd.f32 %v180_v8, %v152_v12  ;;  %v207_v15 = vpop.f32.mrb[3].mxu1  ;;  %v88_v19 = vpop.f32.mrb[2].mxu0 }
  0xe1   :  { %v199_v20 = vpop.f32.mrb[3].mxu0  ;;  %v89_v29 = vadd.f32 %v176_v25, %v88_v19 }
  0xe2   :  { %214 = vpow2.f32 %v184_v13  ;;  %v185_v18 = vmul.f32 -1.442695, %v153_v14 }
  0xe4   :  { %216 = vpow2.f32 %v185_v18 }
  0xec   :  { %v215_v21 = vpop.eup %214 }
  0xed   :  { %v162_v22 = vadd.f32 1.0, %v215_v21 }
  0xee   :  { %v217_v23 = vpop.eup %216 }
  0xef   :  { %218 = vrcp.f32 %v162_v22  ;;  %v163_v24 = vadd.f32 1.0, %v217_v23 }
  0xf1   :  { %220 = vrcp.f32 %v163_v24 }
  0xf9   :  { %v219_v27 = vpop.eup %218 }
  0xfa   :  { %v168_v28 = vmul.f32 %v219_v27, %v86_v26 }
  0xfb   :  { %v221_v30 = vpop.eup %220 }
  0xfc   :  { %170 = vst.msk [vmem:[%s293_s5] sm:$0xff] %vm47_vm1, %v168_v28  ;;  %v169_v31 = vmul.f32 %v221_v30, %v89_v29 }
  0xfe   :  { %171 = vst.msk [vmem:[%s293_s5 + $0x8] sm:$0xff] %vm47_vm1, %v169_v31 }

// kernel: transformer_forward.30
= control target key start
LH: loop header
LB: loop body
LE: loop exit
PB: predicated region body
PF: predicated region fallthrough
CT: control target
= control target key end

     0   :  { %s559_s12 = smov 0   ;;  %s561_s13 = smov 0   ;;  %s609_s0 = inlined_call_operand.vmem [shape: bf16[8,8,8], index: 0, kind: input, shape index: {}]   ;;  %s610_s1 = inlined_call_operand.vmem [shape: bf16[8,8,8], index: 1, kind: input, shape index: {}]   ;;  %s611_s2 = inlined_call_operand.vmem [shape: bf16[8,8,8], index: 2, kind: input, shape index: {}]   ;;  %s612_s3 = inlined_call_operand.vmem [shape: bf16[8,8,8], index: 3, kind: output, shape index: {}]  }
   0x1   :  { %s563_s14 = smov 0  }
   0x2 LB: > { %s25_s15 = sadd.s32 1, %s531_s13  ;;  %p458_p0 = scmp.ge.s32.totalorder %s535_s14, 1  ;;  %s535_s14 = sphi %s563_s14, %s13_s14   ;;  %s531_s13 = sphi %s561_s13, %s614_s13   ;;  %s527_s12 = sphi %s559_s12, %s613_s12  }
   0x3   : > { %p27_p1 = scmp.ge.s32.totalorder %s25_s15, 8  ;;  %p173_p2 = scmp.lt.s32.totalorder %s535_s14, 9 }
   0x5   : > { %s616_s15 = smov (%p27_p1, %s25_s15), 0  ;;  %p174_p3 = pnand %p458_p0, %p173_p2 }
   0x6   : > { %p209_p4 = scmp.lt.s32.totalorder (!%p174_p3), %s527_s12, 7  ;;  %v537_v0 = vmov (!%p174_p3), 0.0   ;;  %vm538_vm0 = vmmov (!%p174_p3), 0   ;;  %vm237_vm1 = vcmask (!%p174_p3), 64512   ;;  %v284_v7 = vlaneseq (!%p174_p3) }
   0x7   : > { %177 = sbr.rel (%p174_p3) target bundleno = 616 (0x268), region = 32  ;;  %471 = vmatprep.subr.bf16.mxu0 (!%p174_p3), %v537_v0  ;;  %473 = vmatprep.mubr.msk.bf16.mxu0 (!%p174_p3), %vm538_vm0, %v537_v0  ;;  %vm307_vm3 = vcmask (!%p174_p3), 1043456   ;;  %vm354_vm4 = vcmask (!%p174_p3), 60416  }
   0x8   : > { %477 = vmatprep.subr.bf16.mxu1 (!%p174_p3), %v537_v0  ;;  %479 = vmatprep.mubr.msk.bf16.mxu1 (!%p174_p3), %vm538_vm0, %v537_v0  ;;  %v285_v8 = vshrl.u32 (!%p174_p3), %v284_v7, 7  ;;  %v290_v9 = vand.u32 (!%p174_p3), 127, %v284_v7 }
   0xa   : > { %vm291_vm2 = vcmp.gt.s32.totalorder (!%p174_p3), %v290_v9, %v285_v8 }
   0xe   : > { %s618_s12 = smov (!%p209_p4, %s527_s12), 7 }
   0xf   : > { %s577_s16 = sshll.u32 %s618_s12, 2 }
  0x10   : > { %s219_s19 = scalar_lea.vmem %s610_s1, %s577_s16  ;;  %s215_s22 = scalar_lea.vmem %s609_s0, %s577_s16 }
  0x11   : > { %v236_v1 = vld [vmem:[%s219_s19] sm:$0xf]  ;;  %s223_s25 = scalar_lea.vmem %s611_s2, %s577_s16  ;;  %s230_s28 = scalar_lea.vmem %s612_s3, %s577_s16 }
  0x12   : > { %v232_v2 = vld [vmem:[%s215_s22] sm:$0xf]  ;;  %v242_v3 = vsel %vm237_vm1, %v236_v1, 0 }
  0x13   : > { %v233_v4 = vunpack.c.l.bf16 %v232_v2  ;;  %472 = vmatpush3.bf16.xpose.msra.mxu0 %v242_v3  ;;  %v303_v16 = vld [vmem:[%s223_s25] sm:$0xf] }
  0x14   : > { %v309_v17 = vsel %vm307_vm3, %v303_v16, 0 }
  0x15   : > { %v234_v5 = vmul.f32 0.35355338, %v233_v4  ;;  %478 = vmatpush3.bf16.msra.mxu1 %v309_v17 }
  0x17   : > { %v235_v6 = vpack.c.bf16 %v234_v5, %v234_v5 }
  0x1a   : > { %474 = vmatmul.mubr.msk.bf16.vlgmr.msra.gmra.mrb[0].mxu0 %vm237_vm1, %v235_v6 }
  0xed   : > { %v278_v10 = vpop.f32.mrb[0].mxu0 }
  0xee   : > { %v292_v11 = vsel %vm291_vm2, -1e+30, %v278_v10  ;;  %v475_v12 = vpop.f32.mrb[1].mxu0 }
  0xef   : > { %v281_v13 = vpop.f32.mrb[2].mxu0  ;;  %v293_v14 = vsel %vm237_vm1, %v292_v11, -inf }
  0xf0   : > { %294 = vmax.xlane.f32.xlu0 %v293_v14  ;;  %v476_v15 = vpop.f32.mrb[3].mxu0 }
 0x17d   : > { %v295_v18 = vpop.xlane.xlu0 %294 }
 0x17e   : > { %v296_v19 = vsub.f32 %v292_v11, %v295_v18 }
 0x180   : > { %v297_v20 = vmul.f32 1.442695, %v296_v19 }
 0x182   : > { %509 = vpow2.f32 %v297_v20 }
 0x18c   : > { %v510_v21 = vpop.eup %509 }
 0x18d   : > { %v299_v22 = vsel %vm237_vm1, %v510_v21, 0.0  ;;  %v302_v23 = vpack.c.bf16 %v510_v21, %v510_v21 }
 0x18e   : > { %300 = vadd.xlane.f32.xlu0 %v299_v22 }
 0x18f   : > { %480 = vmatmul.mubr.msk.bf16.vlgmr.msra.gmra.mrb[0].mxu1 %vm237_vm1, %v302_v23 }
 0x21b   : > { %v301_v24 = vpop.xlane.xlu0 %300 }
 0x21c   : > { %511 = vrcp.f32 %v301_v24 }
 0x226   : > { %v512_v25 = vpop.eup %511 }
 0x262   : > { %v345_v26 = vpop.f32.mrb[0].mxu1 }
 0x263   : > { %v352_v27 = vmul.f32 %v512_v25, %v345_v26  ;;  %v481_v28 = vpop.f32.mrb[1].mxu1 }
 0x264   : > { %v348_v29 = vpop.f32.mrb[2].mxu1 }
 0x265   : > { %v353_v30 = vpack.c.bf16 %v352_v27, %v352_v27  ;;  %v482_v31 = vpop.f32.mrb[3].mxu1 }
 0x267   : > { %355 = vst.msk [vmem:[%s230_s28] sm:$0xf] %vm354_vm4, %v353_v30 }
 0x268 PF: > { %s13_s14 = sadd.s32 1, %s535_s14   ;;  %s613_s12 = smov %s531_s13 }
 0x269   : > { %p10_p5 = scmp.ge.s32.totalorder %s13_s14, 10   ;;  %s614_s13 = smov %s616_s15 }
 0x26b   :  { %12 = sbr.rel (!%p10_p5) target bundleno = 2 (0x2), region = 68 }

// kernel: transformer_forward.32
= control target key start
LH: loop header
LB: loop body
LE: loop exit
PB: predicated region body
PF: predicated region fallthrough
CT: control target
= control target key end

     0   :  { %v124_v0 = vmov 0.0   ;;  %vm125_vm0 = vmmov 0   ;;  %vm41_vm1 = vcmask 261120   ;;  %vm94_vm2 = vcmask 519168   ;;  %s167_s1 = inlined_call_operand.vmem [shape: bf16[32,64], index: 1, kind: input, shape index: {}]   ;;  %s168_s0 = inlined_call_operand.vmem [shape: f32[16,32], index: 0, kind: input, shape index: {}]   ;;  %s169_s2 = inlined_call_operand.vmem [shape: f32[1,64], index: 2, kind: input, shape index: {}]   ;;  %s170_s3 = inlined_call_operand.vmem [shape: bf16[16,64], index: 3, kind: output, shape index: {}]  }
   0x1   :  { %112 = vmatprep.subr.bf16.mxu0 %v124_v0  ;;  %v122_v1 = vld [vmem:[%s167_s1] sm:$0xff]   ;;  %116 = vmatprep.mubr.msk.bf16.mxu0 %vm125_vm0, %v124_v0  ;;  %v123_v2 = vld [vmem:[%s167_s1 + $0x8] sm:$0xff]  }
   0x2   :  { %113 = vmatpush3.bf16.msra.mxu0 %v122_v1  ;;  %v15_v3 = vld [vmem:[%s168_s0] sm:$0xff]  ;;  %v16_v4 = vld [vmem:[%s168_s0 + $0x8] sm:$0xff] }
   0x3   :  { %114 = vmatprep.subr.bf16.mxu0 %v124_v0  ;;  %v17_v5 = vpack.c.bf16 %v16_v4, %v15_v3  ;;  %v101_v6 = vld [vmem:[%s169_s2] ss:$0 sm:$0xff] }
   0x6   :  { %115 = vmatpush3.bf16.msra.mxu0 %v123_v2 }
   0x9   :  { %117 = vmatmul.mubr.msk.bf16.vlgmr.msra.gmra.mrb[0].mxu0 %vm41_vm1, %v17_v5 }
  0xdc   :  { %v79_v7 = vpop.f32.mrb[0].mxu0 }
  0xdd   :  { %v80_v8 = vadd.f32 %v101_v6, %v79_v7  ;;  %v118_v9 = vpop.f32.mrb[1].mxu0 }
  0xde   :  { %v82_v10 = vpop.f32.mrb[2].mxu0 }
  0xdf   :  { %v107_v11 = vpack.c.bf16 %v80_v8, %v80_v8  ;;  %v83_v12 = vadd.f32 %v101_v6, %v82_v10  ;;  %v119_v13 = vpop.f32.mrb[3].mxu0 }
  0xe1   :  { %95 = vst.msk [vmem:[%s170_s3] sm:$0xf] %vm94_vm2, %v107_v11  ;;  %v108_v14 = vpack.c.bf16 %v83_v12, %v83_v12 }
  0xe3   :  { %96 = vst.msk [vmem:[%s170_s3 + $0x4] sm:$0xf] %vm94_vm2, %v108_v14 }

// kernel: transformer_forward.31
= control target key start
LH: loop header
LB: loop body
LE: loop exit
PB: predicated region body
PF: predicated region fallthrough
CT: control target
= control target key end

     0   :  { %v295_v0 = vmov 0.0   ;;  %vm296_vm0 = vmmov 0   ;;  %vm57_vm1 = vcmask 261120   ;;  %vm236_vm2 = vcmask 257024   ;;  %s400_s2 = inlined_call_operand.vmem [shape: bf16[32,32], index: 2, kind: input, shape index: {}]   ;;  %s401_s1 = inlined_call_operand.vmem [shape: bf16[16,32], index: 1, kind: input, shape index: {}]   ;;  %s402_s0 = inlined_call_operand.vmem [shape: f32[16,32], index: 0, kind: input, shape index: {}]   ;;  %s403_s3 = inlined_call_operand.vmem [shape: f32[1,32], index: 3, kind: input, shape index: {}]   ;;  %s404_s8 = inlined_call_operand.vmem [shape: f32[16,32], index: 8, kind: output, shape index: {0}]   ;;  %s405_s6 = inlined_call_operand.vmem [shape: bf16[32,32], index: 6, kind: input, shape index: {}]   ;;  %s406_s4 = inlined_call_operand.vmem [shape: f32[1,32], index: 4, kind: input, shape index: {}]   ;;  %s407_s5 = inlined_call_operand.vmem [shape: f32[1,32], index: 5, kind: input, shape index: {}]   ;;  %s408_s7 = inlined_call_operand.vmem [shape: f32[1,32], index: 7, kind: input, shape index: {}]   ;;  %s409_s9 = inlined_call_operand.vmem [shape: bf16[16,32], index: 9, kind: output, shape index: {1}]  }
   0x1   :  { %268 = vmatprep.subr.bf16.mxu0 %v295_v0  ;;  %v286_v1 = vld [vmem:[%s400_s2] sm:$0xff]   ;;  %272 = vmatprep.mubr.msk.bf16.mxu0 %vm296_vm0, %v295_v0  ;;  %v287_v2 = vld [vmem:[%s400_s2 + $0x8] sm:$0xff]  }
   0x2   :  { %276 = vmatprep.subr.bf16.mxu1 %v295_v0  ;;  %280 = vmatprep.mubr.msk.bf16.mxu1 %vm296_vm0, %v295_v0  ;;  %v288_v3 = vld [vmem:[%s401_s1] sm:$0xff]   ;;  %v33_v7 = vld [vmem:[%s402_s0 + $0x8] sm:$0xff] }
   0x3   :  { %269 = vmatpush3.bf16.msra.mxu0 %v286_v1  ;;  %v32_v4 = vld [vmem:[%s402_s0] sm:$0xff]  ;;  %v290_v28 = vld [vmem:[%s405_s6 + $0x8] sm:$0xff]  }
   0x4   :  { %270 = vmatprep.subr.bf16.mxu0 %v295_v0  ;;  %v251_v6 = vld [vmem:[%s403_s3] ss:$0 sm:$0xff] }
   0x5   :  { %v289_v27 = vld [vmem:[%s405_s6] sm:$0xff]  }
   0x6   :  { %277 = vmatpush3.bf16.msra.mxu1 %v289_v27  ;;  %v252_v37 = vld [vmem:[%s406_s4] ss:$0 sm:$0xff] }
   0x7   :  { %271 = vmatpush3.bf16.msra.mxu0 %v287_v2  ;;  %278 = vmatprep.subr.bf16.mxu1 %v295_v0  ;;  %v253_v41 = vld [vmem:[%s407_s5] ss:$0 sm:$0xff] }
   0x8   :  { %v254_v46 = vld [vmem:[%s408_s7] ss:$0 sm:$0xff] }
   0xa   :  { %273 = vmatmul.mubr.msk.bf16.vlgmr.msra.gmra.mrb[0].mxu0 %vm57_vm1, %v288_v3  ;;  %279 = vmatpush3.bf16.msra.mxu1 %v290_v28 }
  0xdd   :  { %v95_v5 = vpop.f32.mrb[0].mxu0 }
  0xde   :  { %v102_v8 = vadd.f32 %v95_v5, %v32_v4  ;;  %v274_v9 = vpop.f32.mrb[1].mxu0 }
  0xdf   :  { %v98_v10 = vpop.f32.mrb[2].mxu0 }
  0xe0   :  { %v111_v11 = vadd.f32 %v251_v6, %v102_v8  ;;  %v103_v12 = vadd.f32 %v98_v10, %v33_v7  ;;  %v275_v13 = vpop.f32.mrb[3].mxu0 }
  0xe2   :  { %226 = vst.msk [vmem:[%s404_s8] sm:$0xff] %vm57_vm1, %v111_v11  ;;  %v112_v14 = vadd.f32 %v251_v6, %v103_v12  ;;  %v115_v15 = vsel %vm57_vm1, %v111_v11, 0.0 }
  0xe3   :  { %116 = vadd.xlane.f32.xlu0 %v115_v15 }
  0xe4   :  { %227 = vst.msk [vmem:[%s404_s8 + $0x8] sm:$0xff] %vm57_vm1, %v112_v14  ;;  %v118_v16 = vsel %vm57_vm1, %v112_v14, 0.0 }
  0xe7   :  { %119 = vadd.xlane.f32.xlu0 %v118_v16 }
 0x170   :  { %v117_v17 = vpop.xlane.xlu0 %116 }
 0x171   :  { %v122_v18 = vmul.f32 0.03125, %v117_v17 }
 0x173   :  { %v124_v19 = vsub.f32 %v111_v11, %v122_v18 }
 0x174   :  { %v120_v20 = vpop.xlane.xlu0 %119 }
 0x175   :  { %v123_v21 = vmul.f32 0.03125, %v120_v20  ;;  %v126_v22 = vmul.f32 %v124_v19, %v124_v19 }
 0x177   :  { %v125_v23 = vsub.f32 %v112_v14, %v123_v21  ;;  %v128_v24 = vsel %vm57_vm1, %v126_v22, 0.0 }
 0x178   :  { %129 = vadd.xlane.f32.xlu1 %v128_v24 }
 0x179   :  { %v127_v25 = vmul.f32 %v125_v23, %v125_v23 }
 0x17b   :  { %v131_v26 = vsel %vm57_vm1, %v127_v25, 0.0 }
 0x17c   :  { %132 = vadd.xlane.f32.xlu1 %v131_v26 }
 0x205   :  { %v130_v29 = vpop.xlane.xlu1 %129 }
 0x206   :  { %v134_v30 = vmul.f32 0.03125, %v130_v29 }
 0x208   :  { %v136_v31 = vadd.f32 1e-05, %v134_v30 }
 0x209   :  { %v133_v32 = vpop.xlane.xlu1 %132 }
 0x20a   :  { %291 = vrsqrt.f32 %v136_v31  ;;  %v135_v33 = vmul.f32 0.03125, %v133_v32 }
 0x20c   :  { %v137_v34 = vadd.f32 1e-05, %v135_v33 }
 0x20e   :  { %293 = vrsqrt.f32 %v137_v34 }
 0x214   :  { %v292_v35 = vpop.eup %291 }
 0x215   :  { %v140_v36 = vmul.f32 %v292_v35, %v124_v19 }
 0x217   :  { %v148_v40 = vmul.f32 %v252_v37, %v140_v36 }
 0x218   :  { %v294_v38 = vpop.eup %293 }
 0x219   :  { %v141_v39 = vmul.f32 %v294_v38, %v125_v23  ;;  %v156_v43 = vadd.f32 %v253_v41, %v148_v40 }
 0x21b   :  { %v149_v42 = vmul.f32 %v252_v37, %v141_v39 }
 0x21d   :  { %v157_v44 = vadd.f32 %v253_v41, %v149_v42 }
 0x21f   :  { %v158_v45 = vpack.c.bf16 %v157_v44, %v156_v43 }
 0x221   :  { %281 = vmatmul.mubr.msk.bf16.vlgmr.msra.gmra.mrb[0].mxu1 %vm57_vm1, %v158_v45 }
 0x2f4   :  { %v219_v47 = vpop.f32.mrb[0].mxu1 }
 0x2f5   :  { %v220_v48 = vadd.f32 %v254_v46, %v219_v47  ;;  %v282_v49 = vpop.f32.mrb[1].mxu1 }
 0x2f6   :  { %v222_v50 = vpop.f32.mrb[2].mxu1 }
 0x2f7   :  { %v260_v51 = vpack.c.bf16 %v220_v48, %v220_v48  ;;  %v223_v52 = vadd.f32 %v254_v46, %v222_v50  ;;  %v283_v53 = vpop.f32.mrb[3].mxu1 }
 0x2f9   :  { %237 = vst.msk [vmem:[%s409_s9] sm:$0xf] %vm236_vm2, %v260_v51  ;;  %v261_v54 = vpack.c.bf16 %v223_v52, %v223_v52 }
 0x2fb   :  { %238 = vst.msk [vmem:[%s409_s9 + $0x4] sm:$0xf] %vm236_vm2, %v261_v54 }

// kernel: transformer_forward.24
= control target key start
LH: loop header
LB: loop body
LE: loop exit
PB: predicated region body
PF: predicated region fallthrough
CT: control target
= control target key end

     0   :  { %v398_v0 = vmov 0.0   ;;  %vm399_vm0 = vmmov 0   ;;  %vm61_vm1 = vcmask 261120   ;;  %vm265_vm2 = vcmask 523264   ;;  %s538_s2 = inlined_call_operand.vmem [shape: bf16[32,32], index: 2, kind: input, shape index: {}]   ;;  %s539_s1 = inlined_call_operand.vmem [shape: bf16[16,32], index: 1, kind: input, shape index: {}]   ;;  %s540_s0 = inlined_call_operand.vmem [shape: f32[16,32], index: 0, kind: input, shape index: {}]   ;;  %s541_s3 = inlined_call_operand.vmem [shape: f32[1,32], index: 3, kind: input, shape index: {}]   ;;  %s542_s6 = inlined_call_operand.vmem [shape: bf16[32,64], index: 6, kind: input, shape index: {}]   ;;  %s543_s8 = inlined_call_operand.vmem [shape: bf16[64,32], index: 8, kind: input, shape index: {}]   ;;  %s544_s4 = inlined_call_operand.vmem [shape: f32[1,32], index: 4, kind: input, shape index: {}]   ;;  %s545_s5 = inlined_call_operand.vmem [shape: f32[1,32], index: 5, kind: input, shape index: {}]   ;;  %s546_s7 = inlined_call_operand.vmem [shape: f32[1,64], index: 7, kind: input, shape index: {}]   ;;  %s547_s9 = inlined_call_operand.vmem [shape: f32[1,32], index: 9, kind: input, shape index: {}]   ;;  %s548_s10 = inlined_call_operand.vmem [shape: f32[16,32], index: 10, kind: output, shape index: {}]  }
   0x1   :  { %355 = vmatprep.subr.bf16.mxu1 %v398_v0  ;;  %v385_v1 = vld [vmem:[%s538_s2] sm:$0xff]   ;;  %359 = vmatprep.mubr.msk.bf16.mxu1 %vm399_vm0, %v398_v0  ;;  %v386_v2 = vld [vmem:[%s538_s2 + $0x8] sm:$0xff]   ;;  %v392_v48 = vld [vmem:[%s543_s8 + $0x10] sm:$0xff]  }
   0x2   :  { %371 = vmatprep.subr.bf16.mxu0 %v398_v0  ;;  %379 = vmatprep.mubr.msk.bf16.mxu0 %vm399_vm0, %v398_v0  ;;  %v387_v3 = vld [vmem:[%s539_s1] sm:$0xff]   ;;  %v37_v7 = vld [vmem:[%s540_s0 + $0x8] sm:$0xff]  ;;  %v393_v49 = vld [vmem:[%s543_s8 + $0x18] sm:$0xff]  }
   0x3   :  { %356 = vmatpush3.bf16.msra.mxu1 %v385_v1  ;;  %v36_v4 = vld [vmem:[%s540_s0] sm:$0xff]  ;;  %v389_v28 = vld [vmem:[%s542_s6 + $0x8] sm:$0xff]  }
   0x4   :  { %357 = vmatprep.subr.bf16.mxu1 %v398_v0  ;;  %v331_v6 = vld [vmem:[%s541_s3] ss:$0 sm:$0xff]  ;;  %v391_v30 = vld [vmem:[%s543_s8 + $0x8] sm:$0xff]  }
   0x5   :  { %v388_v27 = vld [vmem:[%s542_s6] sm:$0xff]  }
   0x6   :  { %v390_v29 = vld [vmem:[%s543_s8] sm:$0xff]  }
   0x7   :  { %358 = vmatpush3.bf16.msra.mxu1 %v386_v2  ;;  %372 = vmatpush3.bf16.msra.mxu0 %v390_v29  ;;  %v332_v39 = vld [vmem:[%s544_s4] ss:$0 sm:$0xff] }
   0x8   :  { %363 = vmatprep.subr.bf16.mxu1 %v398_v0  ;;  %373 = vmatprep.subr.bf16.mxu0 %v398_v0  ;;  %v333_v43 = vld [vmem:[%s545_s5] ss:$0 sm:$0xff] }
   0x9   :  { %v334_v50 = vld [vmem:[%s546_s7] ss:$0 sm:$0xff] }
   0xa   :  { %360 = vmatmul.mubr.msk.bf16.vlgmr.msra.gmra.mrb[0].mxu1 %vm61_vm1, %v387_v3  ;;  %v343_v61 = vld [vmem:[%s547_s9] ss:$0 sm:$0xff] }
   0xb   :  { %367 = vmatprep.mubr.msk.bf16.mxu1 %vm399_vm0, %v398_v0  ;;  %364 = vmatpush3.bf16.msra.mxu1 %v388_v27 }
   0xc   :  { %365 = vmatprep.subr.bf16.mxu1 %v398_v0  ;;  %374 = vmatpush3.bf16.msra.mxu0 %v391_v30 }
   0xd   :  { %375 = vmatprep.subr.bf16.mxu0 %v398_v0 }
   0xf   :  { %366 = vmatpush3.bf16.msra.mxu1 %v389_v28 }
  0x10   :  { %376 = vmatpush3.bf16.msra.mxu0 %v392_v48 }
  0x11   :  { %377 = vmatprep.subr.bf16.mxu0 %v398_v0 }
  0x14   :  { %378 = vmatpush3.bf16.msra.mxu0 %v393_v49 }
  0xdd   :  { %v99_v5 = vpop.f32.mrb[0].mxu1 }
  0xde   :  { %v106_v8 = vadd.f32 %v99_v5, %v36_v4  ;;  %v361_v9 = vpop.f32.mrb[1].mxu1 }
  0xdf   :  { %v102_v10 = vpop.f32.mrb[2].mxu1 }
  0xe0   :  { %v481_v11 = vadd.f32 %v331_v6, %v106_v8  ;;  %v107_v12 = vadd.f32 %v102_v10, %v37_v7  ;;  %v362_v13 = vpop.f32.mrb[3].mxu1 }
  0xe2   :  { %v483_v14 = vadd.f32 %v331_v6, %v107_v12  ;;  %v119_v15 = vsel %vm61_vm1, %v481_v11, 0.0 }
  0xe3   :  { %120 = vadd.xlane.f32.xlu0 %v119_v15 }
  0xe4   :  { %v122_v16 = vsel %vm61_vm1, %v483_v14, 0.0 }
  0xe7   :  { %123 = vadd.xlane.f32.xlu0 %v122_v16 }
 0x170   :  { %v121_v17 = vpop.xlane.xlu0 %120 }
 0x171   :  { %v126_v18 = vmul.f32 0.03125, %v121_v17 }
 0x173   :  { %v128_v19 = vsub.f32 %v481_v11, %v126_v18 }
 0x174   :  { %v124_v20 = vpop.xlane.xlu0 %123 }
 0x175   :  { %v127_v21 = vmul.f32 0.03125, %v124_v20  ;;  %v130_v22 = vmul.f32 %v128_v19, %v128_v19 }
 0x177   :  { %v129_v23 = vsub.f32 %v483_v14, %v127_v21  ;;  %v132_v24 = vsel %vm61_vm1, %v130_v22, 0.0 }
 0x178   :  { %133 = vadd.xlane.f32.xlu1 %v132_v24 }
 0x179   :  { %v131_v25 = vmul.f32 %v129_v23, %v129_v23 }
 0x17b   :  { %v135_v26 = vsel %vm61_vm1, %v131_v25, 0.0 }
 0x17c   :  { %136 = vadd.xlane.f32.xlu1 %v135_v26 }
 0x205   :  { %v134_v31 = vpop.xlane.xlu1 %133 }
 0x206   :  { %v138_v32 = vmul.f32 0.03125, %v134_v31 }
 0x208   :  { %v140_v33 = vadd.f32 1e-05, %v138_v32 }
 0x209   :  { %v137_v34 = vpop.xlane.xlu1 %136 }
 0x20a   :  { %394 = vrsqrt.f32 %v140_v33  ;;  %v139_v35 = vmul.f32 0.03125, %v137_v34 }
 0x20c   :  { %v141_v36 = vadd.f32 1e-05, %v139_v35 }
 0x20e   :  { %396 = vrsqrt.f32 %v141_v36 }
 0x214   :  { %v395_v37 = vpop.eup %394 }
 0x215   :  { %v144_v38 = vmul.f32 %v395_v37, %v128_v19 }
 0x217   :  { %v152_v41 = vmul.f32 %v332_v39, %v144_v38 }
 0x218   :  { %v397_v40 = vpop.eup %396 }
 0x219   :  { %v145_v42 = vmul.f32 %v397_v40, %v129_v23  ;;  %v160_v45 = vadd.f32 %v333_v43, %v152_v41 }
 0x21b   :  { %v153_v44 = vmul.f32 %v332_v39, %v145_v42 }
 0x21d   :  { %v161_v46 = vadd.f32 %v333_v43, %v153_v44 }
 0x21f   :  { %v162_v47 = vpack.c.bf16 %v161_v46, %v160_v45 }
 0x221   :  { %368 = vmatmul.mubr.msk.bf16.vlgmr.msra.gmra.mrb[4].mxu1 %vm61_vm1, %v162_v47 }
 0x2f4   :  { %v223_v51 = vpop.f32.mrb[4].mxu1 }
 0x2f5   :  { %v224_v52 = vadd.f32 %v334_v50, %v223_v51  ;;  %v369_v53 = vpop.f32.mrb[5].mxu1 }
 0x2f6   :  { %v226_v54 = vpop.f32.mrb[6].mxu1 }
 0x2f7   :  { %v227_v55 = vadd.f32 %v334_v50, %v226_v54  ;;  %v370_v56 = vpop.f32.mrb[7].mxu1  ;;  %v230_v57 = vmax.f32 %v224_v52, 0.0 }
 0x2f9   :  { %v231_v58 = vmax.f32 %v227_v55, 0.0 }
 0x2fb   :  { %v232_v59 = vpack.c.bf16 %v231_v58, %v230_v57 }
 0x2fd   :  { %380 = vmatmul.mubr.msk.bf16.vlgmr.msra.gmra.mrb[0].mxu0 %vm265_vm2, %v232_v59 }
 0x3d0   :  { %v303_v60 = vpop.f32.mrb[0].mxu0 }
 0x3d1   :  { %v310_v62 = vadd.f32 %v303_v60, %v481_v11  ;;  %v381_v63 = vpop.f32.mrb[1].mxu0 }
 0x3d2   :  { %v306_v0 = vpop.f32.mrb[2].mxu0 }
 0x3d3   :  { %v319_v1 = vadd.f32 %v343_v61, %v310_v62  ;;  %v311_v2 = vadd.f32 %v306_v0, %v483_v14  ;;  %v382_v3 = vpop.f32.mrb[3].mxu0 }
 0x3d5   :  { %321 = vst.msk [vmem:[%s548_s10] sm:$0xff] %vm61_vm1, %v319_v1  ;;  %v320_v4 = vadd.f32 %v343_v61, %v311_v2 }
 0x3d7   :  { %322 = vst.msk [vmem:[%s548_s10 + $0x8] sm:$0xff] %vm61_vm1, %v320_v4 }

// kernel: transformer_forward.41
= control target key start
LH: loop header
LB: loop body
LE: loop exit
PB: predicated region body
PF: predicated region fallthrough
CT: control target
= control target key end

     0   :  { %v112_v0 = vmov 0.0   ;;  %vm113_vm0 = vmmov 0   ;;  %vm41_vm1 = vcmask 261120   ;;  %vm86_vm2 = vcmask 408576   ;;  %s155_s1 = inlined_call_operand.vmem [shape: bf16[32,50], index: 1, kind: input, shape index: {}]   ;;  %s156_s0 = inlined_call_operand.vmem [shape: f32[16,32], index: 0, kind: input, shape index: {}]   ;;  %s157_s2 = inlined_call_operand.vmem [shape: f32[1,50], index: 2, kind: input, shape index: {}]   ;;  %s158_s3 = inlined_call_operand.vmem [shape: f32[16,50], index: 3, kind: output, shape index: {}]  }
   0x1   :  { %100 = vmatprep.subr.bf16.mxu0 %v112_v0  ;;  %v110_v1 = vld [vmem:[%s155_s1] sm:$0xff]   ;;  %104 = vmatprep.mubr.msk.bf16.mxu0 %vm113_vm0, %v112_v0  ;;  %v111_v2 = vld [vmem:[%s155_s1 + $0x8] sm:$0xff]  }
   0x2   :  { %101 = vmatpush3.bf16.msra.mxu0 %v110_v1  ;;  %v15_v3 = vld [vmem:[%s156_s0] sm:$0xff]  ;;  %v16_v4 = vld [vmem:[%s156_s0 + $0x8] sm:$0xff] }
   0x3   :  { %102 = vmatprep.subr.bf16.mxu0 %v112_v0  ;;  %v17_v5 = vpack.c.bf16 %v16_v4, %v15_v3  ;;  %v93_v6 = vld [vmem:[%s157_s2] ss:$0 sm:$0xff] }
   0x6   :  { %103 = vmatpush3.bf16.msra.mxu0 %v111_v2 }
   0x9   :  { %105 = vmatmul.mubr.msk.bf16.vlgmr.msra.gmra.mrb[0].mxu0 %vm41_vm1, %v17_v5 }
  0xdc   :  { %v79_v7 = vpop.f32.mrb[0].mxu0 }
  0xdd   :  { %v80_v8 = vadd.f32 %v93_v6, %v79_v7  ;;  %v106_v9 = vpop.f32.mrb[1].mxu0 }
  0xde   :  { %v82_v10 = vpop.f32.mrb[2].mxu0 }
  0xdf   :  { %87 = vst.msk [vmem:[%s158_s3] sm:$0xff] %vm86_vm2, %v80_v8  ;;  %v83_v11 = vadd.f32 %v93_v6, %v82_v10  ;;  %v107_v12 = vpop.f32.mrb[3].mxu0 }
  0xe1   :  { %88 = vst.msk [vmem:[%s158_s3 + $0x8] sm:$0xff] %vm86_vm2, %v83_v11 }

// kernel: transformer_forward.33
= control target key start
LH: loop header
LB: loop body
LE: loop exit
PB: predicated region body
PF: predicated region fallthrough
CT: control target
= control target key end

     0   :  { %s550_s12 = smov 0   ;;  %s552_s13 = smov 0   ;;  %s600_s0 = inlined_call_operand.vmem [shape: bf16[8,8,8], index: 0, kind: input, shape index: {}]   ;;  %s601_s1 = inlined_call_operand.vmem [shape: bf16[8,8,8], index: 1, kind: input, shape index: {}]   ;;  %s602_s2 = inlined_call_operand.vmem [shape: bf16[8,8,8], index: 2, kind: input, shape index: {}]   ;;  %s603_s3 = inlined_call_operand.vmem [shape: bf16[8,8,8], index: 3, kind: output, shape index: {}]  }
   0x1   :  { %s554_s14 = smov 0  }
   0x2 LB: > { %s25_s15 = sadd.s32 1, %s522_s13  ;;  %p449_p0 = scmp.ge.s32.totalorder %s526_s14, 1  ;;  %s526_s14 = sphi %s554_s14, %s13_s14   ;;  %s522_s13 = sphi %s552_s13, %s605_s13   ;;  %s518_s12 = sphi %s550_s12, %s604_s12  }
   0x3   : > { %p27_p1 = scmp.ge.s32.totalorder %s25_s15, 8  ;;  %p173_p2 = scmp.lt.s32.totalorder %s526_s14, 9 }
   0x5   : > { %s607_s15 = smov (%p27_p1, %s25_s15), 0  ;;  %p174_p3 = pnand %p449_p0, %p173_p2 }
   0x6   : > { %p209_p4 = scmp.lt.s32.totalorder (!%p174_p3), %s518_s12, 7  ;;  %v528_v0 = vmov (!%p174_p3), 0.0   ;;  %vm529_vm0 = vmmov (!%p174_p3), 0   ;;  %vm237_vm1 = vcmask (!%p174_p3), 64512   ;;  %vm298_vm2 = vcmask (!%p174_p3), 1043456  }
   0x7   : > { %177 = sbr.rel (%p174_p3) target bundleno = 615 (0x267), region = 32  ;;  %462 = vmatprep.subr.bf16.mxu0 (!%p174_p3), %v528_v0  ;;  %464 = vmatprep.mubr.msk.bf16.mxu0 (!%p174_p3), %vm529_vm0, %v528_v0  ;;  %vm345_vm3 = vcmask (!%p174_p3), 60416  }
   0x8   : > { %468 = vmatprep.subr.bf16.mxu1 (!%p174_p3), %v528_v0  ;;  %470 = vmatprep.mubr.msk.bf16.mxu1 (!%p174_p3), %vm529_vm0, %v528_v0 }
   0xe   : > { %s609_s12 = smov (!%p209_p4, %s518_s12), 7 }
   0xf   : > { %s568_s16 = sshll.u32 %s609_s12, 2 }
  0x10   : > { %s219_s19 = scalar_lea.vmem %s601_s1, %s568_s16  ;;  %s215_s22 = scalar_lea.vmem %s600_s0, %s568_s16 }
  0x11   : > { %v236_v1 = vld [vmem:[%s219_s19] sm:$0xf]  ;;  %s223_s25 = scalar_lea.vmem %s602_s2, %s568_s16  ;;  %s230_s28 = scalar_lea.vmem %s603_s3, %s568_s16 }
  0x12   : > { %v232_v2 = vld [vmem:[%s215_s22] sm:$0xf]  ;;  %v242_v3 = vsel %vm237_vm1, %v236_v1, 0 }
  0x13   : > { %v233_v4 = vunpack.c.l.bf16 %v232_v2  ;;  %463 = vmatpush3.bf16.xpose.msra.mxu0 %v242_v3  ;;  %v294_v12 = vld [vmem:[%s223_s25] sm:$0xf] }
  0x14   : > { %v300_v13 = vsel %vm298_vm2, %v294_v12, 0 }
  0x15   : > { %v234_v5 = vmul.f32 0.35355338, %v233_v4  ;;  %469 = vmatpush3.bf16.msra.mxu1 %v300_v13 }
  0x17   : > { %v235_v6 = vpack.c.bf16 %v234_v5, %v234_v5 }
  0x1a   : > { %465 = vmatmul.mubr.msk.bf16.vlgmr.msra.gmra.mrb[0].mxu0 %vm237_vm1, %v235_v6 }
  0xed   : > { %v278_v7 = vpop.f32.mrb[0].mxu0 }
  0xee   : > { %v466_v8 = vpop.f32.mrb[1].mxu0  ;;  %v284_v9 = vsel %vm237_vm1, %v278_v7, -inf }
  0xef   : > { %285 = vmax.xlane.f32.xlu0 %v284_v9  ;;  %v281_v10 = vpop.f32.mrb[2].mxu0 }
  0xf0   : > { %v467_v11 = vpop.f32.mrb[3].mxu0 }
 0x17c   : > { %v286_v14 = vpop.xlane.xlu0 %285 }
 0x17d   : > { %v287_v15 = vsub.f32 %v278_v7, %v286_v14 }
 0x17f   : > { %v288_v16 = vmul.f32 1.442695, %v287_v15 }
 0x181   : > { %500 = vpow2.f32 %v288_v16 }
 0x18b   : > { %v501_v17 = vpop.eup %500 }
 0x18c   : > { %v290_v18 = vsel %vm237_vm1, %v501_v17, 0.0  ;;  %v293_v19 = vpack.c.bf16 %v501_v17, %v501_v17 }
 0x18d   : > { %291 = vadd.xlane.f32.xlu0 %v290_v18 }
 0x18e   : > { %471 = vmatmul.mubr.msk.bf16.vlgmr.msra.gmra.mrb[0].mxu1 %vm237_vm1, %v293_v19 }
 0x21a   : > { %v292_v20 = vpop.xlane.xlu0 %291 }
 0x21b   : > { %502 = vrcp.f32 %v292_v20 }
 0x225   : > { %v503_v21 = vpop.eup %502 }
 0x261   : > { %v336_v22 = vpop.f32.mrb[0].mxu1 }
 0x262   : > { %v343_v23 = vmul.f32 %v503_v21, %v336_v22  ;;  %v472_v24 = vpop.f32.mrb[1].mxu1 }
 0x263   : > { %v339_v25 = vpop.f32.mrb[2].mxu1 }
 0x264   : > { %v344_v26 = vpack.c.bf16 %v343_v23, %v343_v23  ;;  %v473_v27 = vpop.f32.mrb[3].mxu1 }
 0x266   : > { %346 = vst.msk [vmem:[%s230_s28] sm:$0xf] %vm345_vm3, %v344_v26 }
 0x267 PF: > { %s13_s14 = sadd.s32 1, %s526_s14   ;;  %s604_s12 = smov %s522_s13 }
 0x268   : > { %p10_p5 = scmp.ge.s32.totalorder %s13_s14, 10   ;;  %s605_s13 = smov %s607_s15 }
 0x26a   :  { %12 = sbr.rel (!%p10_p5) target bundleno = 2 (0x2), region = 68 }

</bundles_post_ra>
